<compile_context>
chip_gen: v7x
topology: tpu7x:2x2x1
jax: 0.10.0
libtpu: 0.0.40
codegen_flags: <defaults>
</compile_context>

<pallas_src>
import functools

import jax
import jax.numpy as jnp
from jax import lax
from jax.experimental import pallas as pl
from jax.experimental.pallas import tpu as pltpu


def _round_up(n, m):
    return (n + m - 1) // m * m


# ----------------------------------------------------------------------------
# Fused kernel: biLSTM recurrence + Linear + log_softmax
# ----------------------------------------------------------------------------
def _bilstm_tagger_kernel(emb_ref, len_ref, wih_ref, whh_ref, bg_ref,
                          wout_ref, bout_ref, out_ref, hfwd, hbwd,
                          *, T, B, H, mxu_bf16):
    """Ref shapes:
      emb_ref : (T*B, E)   time-major embeddings, row = t*B + b   (f32 or bf16)
      len_ref : (B, 1)     int32 sequence lengths
      wih_ref : (E, 8H)    [W_ih_f.T | W_ih_b.T], gate order i,f,g,o
      whh_ref : (H, 8H)    [W_hh_f.T | W_hh_b.T]
      bg_ref  : (1, 8H)    [b_ih_f + b_hh_f | b_ih_b + b_hh_b]    (f32)
      wout_ref: (2H, P)    output projection (zero-padded to lane-dense P)
      bout_ref: (1, P)     bias, padded tag columns = -1e30       (f32)
      out_ref : (T*B, P)   log-probs, TIME-major row = t*B + b
      hfwd    : (T*B, H)   VMEM scratch, forward hidden, row t*B+b (each row written once)
      hbwd    : (T*B, H)   VMEM scratch, backward hidden, row t*B+b (each row written once)
    """
    H4 = 4 * H
    mxu_dtype = jnp.bfloat16 if mxu_bf16 else jnp.float32

    def mdot(a, b):
        return jnp.dot(a.astype(mxu_dtype), b.astype(mxu_dtype),
                       preferred_element_type=jnp.float32)

    # ---- hoisted input-side projection: one MXU matmul for all steps & both dirs ----
    xg = mdot(emb_ref[...], wih_ref[...]) + bg_ref[...]           # (T*B, 8H) f32

    whh = whh_ref[...]
    whh_f = whh[:, 0:H4].astype(mxu_dtype)                        # (H, 4H), cast hoisted
    whh_b = whh[:, H4:2 * H4].astype(mxu_dtype)                   # (H, 4H)
    lengths = len_ref[...]                                        # (B, 1) int32

    h_f = jnp.zeros((B, H), jnp.float32)
    c_f = jnp.zeros((B, H), jnp.float32)
    h_b = jnp.zeros((B, H), jnp.float32)
    c_b = jnp.zeros((B, H), jnp.float32)

    def lstm_cell(gates, c_prev):                                 # all-f32 elementwise
        i = jax.nn.sigmoid(gates[:, 0:H])
        f = jax.nn.sigmoid(gates[:, H:2 * H])
        g = jnp.tanh(gates[:, 2 * H:3 * H])
        o = jax.nn.sigmoid(gates[:, 3 * H:4 * H])
        c_new = f * c_prev + i * g
        return o * jnp.tanh(c_new), c_new

    # Fully unrolled: T is small & static here.
    # TODO(synk): at production T switch to lax.fori_loop carrying (h,c) to bound
    #             vreg live ranges, with pl.ds(t*B, B) + pl.multiple_of slices.
    for t in range(T):
        tb = T - 1 - t                                            # backward time index

        # forward direction, time t: (B,H)@(H,4H) onto a static row-block of xg
        gates_f = xg[t * B:(t + 1) * B, 0:H4] + mdot(h_f, whh_f)
        hf_new, cf_new = lstm_cell(gates_f, c_f)
        valid_f = lengths > t                                     # (B,1) packed-seq mask
        h_f = jnp.where(valid_f, hf_new, h_f)
        c_f = jnp.where(valid_f, cf_new, c_f)

        # backward direction, time tb
        gates_b = xg[tb * B:(tb + 1) * B, H4:2 * H4] + mdot(h_b, whh_b)
        hb_new, cb_new = lstm_cell(gates_b, c_b)
        valid_b = lengths > tb
        h_b = jnp.where(valid_b, hb_new, h_b)
        c_b = jnp.where(valid_b, cb_new, c_b)

        # pad_packed_sequence semantics: pad positions emit zeros.
        # Whole (B, H) block stores, time-major, lane offset 0 in both buffers
        # (no per-row scatter, no lane-offset column writes).
        hfwd[t * B:(t + 1) * B, :] = jnp.where(valid_f, h_f, 0.0)
        hbwd[tb * B:(tb + 1) * B, :] = jnp.where(valid_b, h_b, 0.0)

    # ---- fused Linear + log_softmax epilogue (lane-dense P output) ----
    wout = wout_ref[...]
    logits = (mdot(hfwd[...], wout[0:H, :]) +
              mdot(hbwd[...], wout[H:2 * H, :]) + bout_ref[...])  # (T*B, P) f32
    mx = jnp.max(logits, axis=1, keepdims=True)
    z = logits - mx
    lse = jnp.log(jnp.sum(jnp.exp(z), axis=1, keepdims=True))
    out_ref[...] = z - lse


# ----------------------------------------------------------------------------
# Parameters (PyTorch-equivalent init, pre-fused layouts for the kernel)
# ----------------------------------------------------------------------------
def init_params(key, vocab_size, embedding_dim, hidden_dim, tags_size, padding_idx):
    ks = jax.random.split(key, 11)
    E, H = embedding_dim, hidden_dim
    k = 1.0 / (H ** 0.5)

    def u(kk, shape, bound):
        return jax.random.uniform(kk, shape, jnp.float32, -bound, bound)

    emb = jax.random.normal(ks[0], (vocab_size, E), jnp.float32)
    emb = emb.at[padding_idx].set(0.0)                  # padding_idx row is zero

    # PyTorch LSTM layout (4H, in), gate order i,f,g,o; transposed for x @ W.
    wih_f = u(ks[1], (4 * H, E), k).T                   # (E, 4H)
    whh_f = u(ks[2], (4 * H, H), k).T                   # (H, 4H)
    b_f = u(ks[3], (4 * H,), k) + u(ks[4], (4 * H,), k)
    wih_b = u(ks[5], (4 * H, E), k).T
    whh_b = u(ks[6], (4 * H, H), k).T
    b_b = u(ks[7], (4 * H,), k) + u(ks[8], (4 * H,), k)

    wih_cat = jnp.concatenate([wih_f, wih_b], axis=1)             # (E, 8H)
    whh_cat = jnp.concatenate([whh_f, whh_b], axis=1)             # (H, 8H)
    b_cat = jnp.concatenate([b_f, b_b])[None, :]                  # (1, 8H)

    ko = 1.0 / ((2 * H) ** 0.5)
    w_out = u(ks[9], (tags_size, 2 * H), ko).T                    # (2H, tags)
    b_out = u(ks[10], (tags_size,), ko)
    P = _round_up(tags_size, 128)                                 # lane-dense tag dim
    w_out_pad = jnp.zeros((2 * H, P), jnp.float32).at[:, :tags_size].set(w_out)
    b_out_pad = jnp.full((1, P), -1e30, jnp.float32).at[0, :tags_size].set(b_out)

    return dict(embedding=emb, wih_cat=wih_cat, whh_cat=whh_cat, b_cat=b_cat,
                w_out_pad=w_out_pad, b_out_pad=b_out_pad)


# ----------------------------------------------------------------------------
# Forward pass (same semantics as BaseModel.forward)
# ----------------------------------------------------------------------------
@functools.partial(jax.jit, static_argnums=(3, 4))
def model_forward(x, x_lengths, params, tags_size, mxu_bf16=False):
    """x: (B, T) int32 token ids; x_lengths: (B,) int32 (sorted descending, as
    BaseModel.padding() produces).  Returns tag_scores: (B*T, tags_size) log-probs,
    row order b*T + t like the PyTorch forward's output.reshape(-1, 2H)."""
    B, T = x.shape
    E = params['embedding'].shape[1]
    H = params['whh_cat'].shape[0]
    P = params['w_out_pad'].shape[1]
    mxu_dtype = jnp.bfloat16 if mxu_bf16 else jnp.float32

    # Embedding gather stays in plain JAX (data-dependent row gather); emitted
    # time-major so per-step kernel slices are contiguous static row blocks.
    emb2d = params['embedding'][x.T].reshape(T * B, E).astype(mxu_dtype)
    lens = x_lengths.astype(jnp.int32).reshape(B, 1)

    kernel = functools.partial(_bilstm_tagger_kernel, T=T, B=B, H=H, mxu_bf16=mxu_bf16)
    vmem = pl.BlockSpec(memory_space=pltpu.MemorySpace.VMEM)
    out_tm = pl.pallas_call(
        kernel,
        out_shape=jax.ShapeDtypeStruct((T * B, P), jnp.float32),
        in_specs=[vmem] * 7,
        out_specs=vmem,
        scratch_shapes=[pltpu.VMEM((T * B, H), jnp.float32),    # fwd hidden, time-major
                        pltpu.VMEM((T * B, H), jnp.float32)],   # bwd hidden, time-major
        compiler_params=pltpu.CompilerParams(vmem_limit_bytes=32 * 1024 * 1024),
    )(emb2d, lens,
      params['wih_cat'].astype(mxu_dtype), params['whh_cat'].astype(mxu_dtype),
      params['b_cat'], params['w_out_pad'].astype(mxu_dtype), params['b_out_pad'])

    # Restore batch-first row order b*T + t with a single cheap transpose outside the
    # kernel (the kernel's serial path now only does contiguous block stores).
    out = jnp.transpose(out_tm.reshape(T, B, P), (1, 0, 2)).reshape(B * T, P)
    return out[:, :tags_size]


# ----------------------------------------------------------------------------
# Pure-JAX reference (for a self-check only)
# ----------------------------------------------------------------------------
def _reference_forward(x, x_lengths, params, tags_size):
    H = params['whh_cat'].shape[0]
    H4 = 4 * H
    emb = params['embedding'][x]                            # (B, T, E)
    B, T, _ = emb.shape
    lens = x_lengths[:, None]
    hp = jax.lax.Precision.HIGHEST

    def run_dir(wih, whh, b, reverse):
        h = jnp.zeros((B, H), jnp.float32)
        c = jnp.zeros((B, H), jnp.float32)
        outs = [None] * T
        times = range(T - 1, -1, -1) if reverse else range(T)
        for t in times:
            gates = (jnp.dot(emb[:, t], wih, precision=hp)
                     + jnp.dot(h, whh, precision=hp) + b)
            i = jax.nn.sigmoid(gates[:, 0:H])
            f = jax.nn.sigmoid(gates[:, H:2 * H])
            g = jnp.tanh(gates[:, 2 * H:3 * H])
            o = jax.nn.sigmoid(gates[:, 3 * H:4 * H])
            c_new = f * c + i * g
            h_new = o * jnp.tanh(c_new)
            m = lens > t
            h = jnp.where(m, h_new, h)
            c = jnp.where(m, c_new, c)
            outs[t] = jnp.where(m, h, 0.0)
        return jnp.stack(outs, axis=1)                      # (B, T, H)

    out_f = run_dir(params['wih_cat'][:, :H4], params['whh_cat'][:, :H4],
                    params['b_cat'][:, :H4], reverse=False)
    out_b = run_dir(params['wih_cat'][:, H4:], params['whh_cat'][:, H4:],
                    params['b_cat'][:, H4:], reverse=True)
    h2d = jnp.concatenate([out_f, out_b], axis=-1).reshape(B * T, 2 * H)
    logits = (jnp.dot(h2d, params['w_out_pad'][:, :tags_size], precision=hp)
              + params['b_out_pad'][:, :tags_size])
    return jax.nn.log_softmax(logits, axis=1)


if __name__ == "__main__":
    # Small synthetic config (DataProcessor / vocab not available; sizes consistent
    # with the module's __init__).
    vocab_size, tags_size = 50, 10
    embedding_dim, hidden_dim = 32, 32
    batch_size, seq_len = 2, 8
    padding_idx = 0

    key = jax.random.PRNGKey(0)
    pkey, xkey = jax.random.split(key)
    params = init_params(pkey, vocab_size, embedding_dim, hidden_dim,
                         tags_size, padding_idx)

    # Token ids, lengths sorted descending (as BaseModel.padding() produces).
    x_lengths = jnp.array([8, 5], dtype=jnp.int32)
    x = jax.random.randint(xkey, (batch_size, seq_len), 1, vocab_size, jnp.int32)
    pad_mask = jnp.arange(seq_len)[None, :] < x_lengths[:, None]
    x = jnp.where(pad_mask, x, padding_idx)

    # f32 path: tight check against the plain-JAX reference.
    tag_scores = model_forward(x, x_lengths, params, tags_size, False)
    jax.block_until_ready(tag_scores)
    assert tag_scores.shape == (batch_size * seq_len, tags_size)
    row_sums = jnp.exp(tag_scores).sum(axis=1)
    assert bool(jnp.allclose(row_sums, 1.0, atol=1e-4))
    ref = _reference_forward(x, x_lengths, params, tags_size)
    assert bool(jnp.allclose(tag_scores, ref, atol=1e-3, rtol=1e-3))

    # bf16-MXU-operand fast path (v6e/v7x): elementwise math stays f32.
    tag_scores_bf16 = model_forward(x, x_lengths, params, tags_size, True)
    jax.block_until_ready(tag_scores_bf16)
    assert tag_scores_bf16.shape == (batch_size * seq_len, tags_size)
    assert bool(jnp.allclose(jnp.exp(tag_scores_bf16).sum(axis=1), 1.0, atol=1e-3))
    assert bool(jnp.allclose(tag_scores_bf16, ref, atol=1e-1, rtol=1e-1))

    print("KERNEL_OK")
</pallas_src>

<mosaic_0001>
module attributes {stable_mosaic.version = 11 : i64} {
  func.func @_bilstm_tagger_kernel(%arg0: memref<16x32xf32, #tpu.memory_space<vmem>>, %arg1: memref<2x1xi32, #tpu.memory_space<vmem>>, %arg2: memref<32x256xf32, #tpu.memory_space<vmem>>, %arg3: memref<32x256xf32, #tpu.memory_space<vmem>>, %arg4: memref<1x256xf32, #tpu.memory_space<vmem>>, %arg5: memref<64x128xf32, #tpu.memory_space<vmem>>, %arg6: memref<1x128xf32, #tpu.memory_space<vmem>>, %arg7: memref<16x128xf32, #tpu.memory_space<vmem>>, %arg8: memref<16x32xf32, #tpu.memory_space<vmem>>, %arg9: memref<16x32xf32, #tpu.memory_space<vmem>>) attributes {dimension_semantics = [], scalar_prefetch = 0 : i64, scratch_operands = 2 : i64, tpu.core_type = #tpu.core_type<tc>} {
    %c0 = arith.constant 0 : index
    %c0_0 = arith.constant 0 : index
    %0 = vector.load %arg0[%c0, %c0_0] : memref<16x32xf32, #tpu.memory_space<vmem>>, vector<16x32xf32>
    %c0_1 = arith.constant 0 : index
    %c0_2 = arith.constant 0 : index
    %1 = vector.load %arg2[%c0_1, %c0_2] : memref<32x256xf32, #tpu.memory_space<vmem>>, vector<32x256xf32>
    %cst = arith.constant dense<0.000000e+00> : vector<16x256xf32>
    %2 = tpu.matmul %0, %1, %cst {dimension_numbers = #tpu.dot_dimension_numbers<[1], [0], [0], [1], [0, 0, 1, 1], [], []>} : vector<16x32xf32>, vector<32x256xf32>, vector<16x256xf32> -> vector<16x256xf32>
    %c0_3 = arith.constant 0 : index
    %c0_4 = arith.constant 0 : index
    %3 = vector.load %arg4[%c0_3, %c0_4] : memref<1x256xf32, #tpu.memory_space<vmem>>, vector<1x256xf32>
    %4 = vector.broadcast %3 : vector<1x256xf32> to vector<16x256xf32>
    %5 = arith.addf %2, %4 : vector<16x256xf32>
    %c0_5 = arith.constant 0 : index
    %c0_6 = arith.constant 0 : index
    %6 = vector.load %arg3[%c0_5, %c0_6] : memref<32x256xf32, #tpu.memory_space<vmem>>, vector<32x256xf32>
    %7 = vector.extract_strided_slice %6 {offsets = [0, 0], sizes = [32, 128], strides = [1, 1]} : vector<32x256xf32> to vector<32x128xf32>
    %8 = vector.extract_strided_slice %6 {offsets = [0, 128], sizes = [32, 128], strides = [1, 1]} : vector<32x256xf32> to vector<32x128xf32>
    %c0_7 = arith.constant 0 : index
    %c0_8 = arith.constant 0 : index
    %9 = vector.load %arg1[%c0_7, %c0_8] : memref<2x1xi32, #tpu.memory_space<vmem>>, vector<2x1xi32>
    %cst_9 = arith.constant 0.000000e+00 : f32
    %10 = vector.broadcast %cst_9 : f32 to vector<2x32xf32>
    %cst_10 = arith.constant 0.000000e+00 : f32
    %11 = vector.broadcast %cst_10 : f32 to vector<2x32xf32>
    %cst_11 = arith.constant 0.000000e+00 : f32
    %12 = vector.broadcast %cst_11 : f32 to vector<2x32xf32>
    %cst_12 = arith.constant 0.000000e+00 : f32
    %13 = vector.broadcast %cst_12 : f32 to vector<2x32xf32>
    %14 = vector.extract_strided_slice %5 {offsets = [0, 0], sizes = [2, 128], strides = [1, 1]} : vector<16x256xf32> to vector<2x128xf32>
    %cst_13 = arith.constant dense<0.000000e+00> : vector<2x128xf32>
    %15 = tpu.matmul %10, %7, %cst_13 {dimension_numbers = #tpu.dot_dimension_numbers<[1], [0], [0], [1], [0, 0, 1, 1], [], []>} : vector<2x32xf32>, vector<32x128xf32>, vector<2x128xf32> -> vector<2x128xf32>
    %16 = arith.addf %14, %15 : vector<2x128xf32>
    %17 = vector.extract_strided_slice %16 {offsets = [0, 0], sizes = [2, 32], strides = [1, 1]} : vector<2x128xf32> to vector<2x32xf32>
    %18 = arith.negf %17 : vector<2x32xf32>
    %19 = math.exp %18 : vector<2x32xf32>
    %cst_14 = arith.constant 1.000000e+00 : f32
    %20 = vector.broadcast %cst_14 : f32 to vector<2x32xf32>
    %21 = arith.addf %20, %19 : vector<2x32xf32>
    %22 = arith.divf %20, %21 : vector<2x32xf32>
    %23 = vector.extract_strided_slice %16 {offsets = [0, 32], sizes = [2, 32], strides = [1, 1]} : vector<2x128xf32> to vector<2x32xf32>
    %24 = arith.negf %23 : vector<2x32xf32>
    %25 = math.exp %24 : vector<2x32xf32>
    %cst_15 = arith.constant 1.000000e+00 : f32
    %26 = vector.broadcast %cst_15 : f32 to vector<2x32xf32>
    %27 = arith.addf %26, %25 : vector<2x32xf32>
    %28 = arith.divf %26, %27 : vector<2x32xf32>
    %29 = vector.extract_strided_slice %16 {offsets = [0, 64], sizes = [2, 32], strides = [1, 1]} : vector<2x128xf32> to vector<2x32xf32>
    %30 = math.tanh %29 : vector<2x32xf32>
    %31 = vector.extract_strided_slice %16 {offsets = [0, 96], sizes = [2, 32], strides = [1, 1]} : vector<2x128xf32> to vector<2x32xf32>
    %32 = arith.negf %31 : vector<2x32xf32>
    %33 = math.exp %32 : vector<2x32xf32>
    %cst_16 = arith.constant 1.000000e+00 : f32
    %34 = vector.broadcast %cst_16 : f32 to vector<2x32xf32>
    %35 = arith.addf %34, %33 : vector<2x32xf32>
    %36 = arith.divf %34, %35 : vector<2x32xf32>
    %37 = arith.mulf %28, %11 : vector<2x32xf32>
    %38 = arith.mulf %22, %30 : vector<2x32xf32>
    %39 = arith.addf %37, %38 : vector<2x32xf32>
    %40 = math.tanh %39 : vector<2x32xf32>
    %41 = arith.mulf %36, %40 : vector<2x32xf32>
    %c0_i32 = arith.constant 0 : i32
    %42 = vector.broadcast %c0_i32 : i32 to vector<2x1xi32>
    %43 = arith.cmpi sgt, %9, %42 : vector<2x1xi32>
    %44 = vector.shape_cast %43 : vector<2x1xi1> to vector<2x1xi1>
    %45 = vector.broadcast %44 : vector<2x1xi1> to vector<2x32xi1>
    %46 = arith.select %45, %41, %10 : vector<2x32xi1>, vector<2x32xf32>
    %47 = vector.shape_cast %43 : vector<2x1xi1> to vector<2x1xi1>
    %48 = vector.broadcast %47 : vector<2x1xi1> to vector<2x32xi1>
    %49 = arith.select %48, %39, %11 : vector<2x32xi1>, vector<2x32xf32>
    %50 = vector.extract_strided_slice %5 {offsets = [14, 128], sizes = [2, 128], strides = [1, 1]} : vector<16x256xf32> to vector<2x128xf32>
    %cst_17 = arith.constant dense<0.000000e+00> : vector<2x128xf32>
    %51 = tpu.matmul %12, %8, %cst_17 {dimension_numbers = #tpu.dot_dimension_numbers<[1], [0], [0], [1], [0, 0, 1, 1], [], []>} : vector<2x32xf32>, vector<32x128xf32>, vector<2x128xf32> -> vector<2x128xf32>
    %52 = arith.addf %50, %51 : vector<2x128xf32>
    %53 = vector.extract_strided_slice %52 {offsets = [0, 0], sizes = [2, 32], strides = [1, 1]} : vector<2x128xf32> to vector<2x32xf32>
    %54 = arith.negf %53 : vector<2x32xf32>
    %55 = math.exp %54 : vector<2x32xf32>
    %cst_18 = arith.constant 1.000000e+00 : f32
    %56 = vector.broadcast %cst_18 : f32 to vector<2x32xf32>
    %57 = arith.addf %56, %55 : vector<2x32xf32>
    %58 = arith.divf %56, %57 : vector<2x32xf32>
    %59 = vector.extract_strided_slice %52 {offsets = [0, 32], sizes = [2, 32], strides = [1, 1]} : vector<2x128xf32> to vector<2x32xf32>
    %60 = arith.negf %59 : vector<2x32xf32>
    %61 = math.exp %60 : vector<2x32xf32>
    %cst_19 = arith.constant 1.000000e+00 : f32
    %62 = vector.broadcast %cst_19 : f32 to vector<2x32xf32>
    %63 = arith.addf %62, %61 : vector<2x32xf32>
    %64 = arith.divf %62, %63 : vector<2x32xf32>
    %65 = vector.extract_strided_slice %52 {offsets = [0, 64], sizes = [2, 32], strides = [1, 1]} : vector<2x128xf32> to vector<2x32xf32>
    %66 = math.tanh %65 : vector<2x32xf32>
    %67 = vector.extract_strided_slice %52 {offsets = [0, 96], sizes = [2, 32], strides = [1, 1]} : vector<2x128xf32> to vector<2x32xf32>
    %68 = arith.negf %67 : vector<2x32xf32>
    %69 = math.exp %68 : vector<2x32xf32>
    %cst_20 = arith.constant 1.000000e+00 : f32
    %70 = vector.broadcast %cst_20 : f32 to vector<2x32xf32>
    %71 = arith.addf %70, %69 : vector<2x32xf32>
    %72 = arith.divf %70, %71 : vector<2x32xf32>
    %73 = arith.mulf %64, %13 : vector<2x32xf32>
    %74 = arith.mulf %58, %66 : vector<2x32xf32>
    %75 = arith.addf %73, %74 : vector<2x32xf32>
    %76 = math.tanh %75 : vector<2x32xf32>
    %77 = arith.mulf %72, %76 : vector<2x32xf32>
    %c7_i32 = arith.constant 7 : i32
    %78 = vector.broadcast %c7_i32 : i32 to vector<2x1xi32>
    %79 = arith.cmpi sgt, %9, %78 : vector<2x1xi32>
    %80 = vector.shape_cast %79 : vector<2x1xi1> to vector<2x1xi1>
    %81 = vector.broadcast %80 : vector<2x1xi1> to vector<2x32xi1>
    %82 = arith.select %81, %77, %12 : vector<2x32xi1>, vector<2x32xf32>
    %83 = vector.shape_cast %79 : vector<2x1xi1> to vector<2x1xi1>
    %84 = vector.broadcast %83 : vector<2x1xi1> to vector<2x32xi1>
    %85 = arith.select %84, %75, %13 : vector<2x32xi1>, vector<2x32xf32>
    %cst_21 = arith.constant 0.000000e+00 : f32
    %86 = vector.shape_cast %43 : vector<2x1xi1> to vector<2x1xi1>
    %87 = vector.broadcast %86 : vector<2x1xi1> to vector<2x32xi1>
    %88 = vector.broadcast %cst_21 : f32 to vector<2x32xf32>
    %89 = arith.select %87, %46, %88 : vector<2x32xi1>, vector<2x32xf32>
    %c0_22 = arith.constant 0 : index
    %c0_23 = arith.constant 0 : index
    %90 = vector.load %arg8[%c0_22, %c0_23] : memref<16x32xf32, #tpu.memory_space<vmem>>, vector<2x32xf32>
    tpu.vector_store %arg8[%c0_22, %c0_23], %89 {strides = array<i32>} : memref<16x32xf32, #tpu.memory_space<vmem>>, vector<2x32xf32>,
    %cst_24 = arith.constant 0.000000e+00 : f32
    %91 = vector.shape_cast %79 : vector<2x1xi1> to vector<2x1xi1>
    %92 = vector.broadcast %91 : vector<2x1xi1> to vector<2x32xi1>
    %93 = vector.broadcast %cst_24 : f32 to vector<2x32xf32>
    %94 = arith.select %92, %82, %93 : vector<2x32xi1>, vector<2x32xf32>
    %c14 = arith.constant 14 : index
    %c0_25 = arith.constant 0 : index
    %95 = vector.load %arg9[%c14, %c0_25] : memref<16x32xf32, #tpu.memory_space<vmem>>, vector<2x32xf32>
    tpu.vector_store %arg9[%c14, %c0_25], %94 {strides = array<i32>} : memref<16x32xf32, #tpu.memory_space<vmem>>, vector<2x32xf32>,
    %96 = vector.extract_strided_slice %5 {offsets = [2, 0], sizes = [2, 128], strides = [1, 1]} : vector<16x256xf32> to vector<2x128xf32>
    %cst_26 = arith.constant dense<0.000000e+00> : vector<2x128xf32>
    %97 = tpu.matmul %46, %7, %cst_26 {dimension_numbers = #tpu.dot_dimension_numbers<[1], [0], [0], [1], [0, 0, 1, 1], [], []>} : vector<2x32xf32>, vector<32x128xf32>, vector<2x128xf32> -> vector<2x128xf32>
    %98 = arith.addf %96, %97 : vector<2x128xf32>
    %99 = vector.extract_strided_slice %98 {offsets = [0, 0], sizes = [2, 32], strides = [1, 1]} : vector<2x128xf32> to vector<2x32xf32>
    %100 = arith.negf %99 : vector<2x32xf32>
    %101 = math.exp %100 : vector<2x32xf32>
    %cst_27 = arith.constant 1.000000e+00 : f32
    %102 = vector.broadcast %cst_27 : f32 to vector<2x32xf32>
    %103 = arith.addf %102, %101 : vector<2x32xf32>
    %104 = arith.divf %102, %103 : vector<2x32xf32>
    %105 = vector.extract_strided_slice %98 {offsets = [0, 32], sizes = [2, 32], strides = [1, 1]} : vector<2x128xf32> to vector<2x32xf32>
    %106 = arith.negf %105 : vector<2x32xf32>
    %107 = math.exp %106 : vector<2x32xf32>
    %cst_28 = arith.constant 1.000000e+00 : f32
    %108 = vector.broadcast %cst_28 : f32 to vector<2x32xf32>
    %109 = arith.addf %108, %107 : vector<2x32xf32>
    %110 = arith.divf %108, %109 : vector<2x32xf32>
    %111 = vector.extract_strided_slice %98 {offsets = [0, 64], sizes = [2, 32], strides = [1, 1]} : vector<2x128xf32> to vector<2x32xf32>
    %112 = math.tanh %111 : vector<2x32xf32>
    %113 = vector.extract_strided_slice %98 {offsets = [0, 96], sizes = [2, 32], strides = [1, 1]} : vector<2x128xf32> to vector<2x32xf32>
    %114 = arith.negf %113 : vector<2x32xf32>
    %115 = math.exp %114 : vector<2x32xf32>
    %cst_29 = arith.constant 1.000000e+00 : f32
    %116 = vector.broadcast %cst_29 : f32 to vector<2x32xf32>
    %117 = arith.addf %116, %115 : vector<2x32xf32>
    %118 = arith.divf %116, %117 : vector<2x32xf32>
    %119 = arith.mulf %110, %49 : vector<2x32xf32>
    %120 = arith.mulf %104, %112 : vector<2x32xf32>
    %121 = arith.addf %119, %120 : vector<2x32xf32>
    %122 = math.tanh %121 : vector<2x32xf32>
    %123 = arith.mulf %118, %122 : vector<2x32xf32>
    %c1_i32 = arith.constant 1 : i32
    %124 = vector.broadcast %c1_i32 : i32 to vector<2x1xi32>
    %125 = arith.cmpi sgt, %9, %124 : vector<2x1xi32>
    %126 = vector.shape_cast %125 : vector<2x1xi1> to vector<2x1xi1>
    %127 = vector.broadcast %126 : vector<2x1xi1> to vector<2x32xi1>
    %128 = arith.select %127, %123, %46 : vector<2x32xi1>, vector<2x32xf32>
    %129 = vector.shape_cast %125 : vector<2x1xi1> to vector<2x1xi1>
    %130 = vector.broadcast %129 : vector<2x1xi1> to vector<2x32xi1>
    %131 = arith.select %130, %121, %49 : vector<2x32xi1>, vector<2x32xf32>
    %132 = vector.extract_strided_slice %5 {offsets = [12, 128], sizes = [2, 128], strides = [1, 1]} : vector<16x256xf32> to vector<2x128xf32>
    %cst_30 = arith.constant dense<0.000000e+00> : vector<2x128xf32>
    %133 = tpu.matmul %82, %8, %cst_30 {dimension_numbers = #tpu.dot_dimension_numbers<[1], [0], [0], [1], [0, 0, 1, 1], [], []>} : vector<2x32xf32>, vector<32x128xf32>, vector<2x128xf32> -> vector<2x128xf32>
    %134 = arith.addf %132, %133 : vector<2x128xf32>
    %135 = vector.extract_strided_slice %134 {offsets = [0, 0], sizes = [2, 32], strides = [1, 1]} : vector<2x128xf32> to vector<2x32xf32>
    %136 = arith.negf %135 : vector<2x32xf32>
    %137 = math.exp %136 : vector<2x32xf32>
    %cst_31 = arith.constant 1.000000e+00 : f32
    %138 = vector.broadcast %cst_31 : f32 to vector<2x32xf32>
    %139 = arith.addf %138, %137 : vector<2x32xf32>
    %140 = arith.divf %138, %139 : vector<2x32xf32>
    %141 = vector.extract_strided_slice %134 {offsets = [0, 32], sizes = [2, 32], strides = [1, 1]} : vector<2x128xf32> to vector<2x32xf32>
    %142 = arith.negf %141 : vector<2x32xf32>
    %143 = math.exp %142 : vector<2x32xf32>
    %cst_32 = arith.constant 1.000000e+00 : f32
    %144 = vector.broadcast %cst_32 : f32 to vector<2x32xf32>
    %145 = arith.addf %144, %143 : vector<2x32xf32>
    %146 = arith.divf %144, %145 : vector<2x32xf32>
    %147 = vector.extract_strided_slice %134 {offsets = [0, 64], sizes = [2, 32], strides = [1, 1]} : vector<2x128xf32> to vector<2x32xf32>
    %148 = math.tanh %147 : vector<2x32xf32>
    %149 = vector.extract_strided_slice %134 {offsets = [0, 96], sizes = [2, 32], strides = [1, 1]} : vector<2x128xf32> to vector<2x32xf32>
    %150 = arith.negf %149 : vector<2x32xf32>
    %151 = math.exp %150 : vector<2x32xf32>
    %cst_33 = arith.constant 1.000000e+00 : f32
    %152 = vector.broadcast %cst_33 : f32 to vector<2x32xf32>
    %153 = arith.addf %152, %151 : vector<2x32xf32>
    %154 = arith.divf %152, %153 : vector<2x32xf32>
    %155 = arith.mulf %146, %85 : vector<2x32xf32>
    %156 = arith.mulf %140, %148 : vector<2x32xf32>
    %157 = arith.addf %155, %156 : vector<2x32xf32>
    %158 = math.tanh %157 : vector<2x32xf32>
    %159 = arith.mulf %154, %158 : vector<2x32xf32>
    %c6_i32 = arith.constant 6 : i32
    %160 = vector.broadcast %c6_i32 : i32 to vector<2x1xi32>
    %161 = arith.cmpi sgt, %9, %160 : vector<2x1xi32>
    %162 = vector.shape_cast %161 : vector<2x1xi1> to vector<2x1xi1>
    %163 = vector.broadcast %162 : vector<2x1xi1> to vector<2x32xi1>
    %164 = arith.select %163, %159, %82 : vector<2x32xi1>, vector<2x32xf32>
    %165 = vector.shape_cast %161 : vector<2x1xi1> to vector<2x1xi1>
    %166 = vector.broadcast %165 : vector<2x1xi1> to vector<2x32xi1>
    %167 = arith.select %166, %157, %85 : vector<2x32xi1>, vector<2x32xf32>
    %cst_34 = arith.constant 0.000000e+00 : f32
    %168 = vector.shape_cast %125 : vector<2x1xi1> to vector<2x1xi1>
    %169 = vector.broadcast %168 : vector<2x1xi1> to vector<2x32xi1>
    %170 = vector.broadcast %cst_34 : f32 to vector<2x32xf32>
    %171 = arith.select %169, %128, %170 : vector<2x32xi1>, vector<2x32xf32>
    %c2 = arith.constant 2 : index
    %c0_35 = arith.constant 0 : index
    %172 = vector.load %arg8[%c2, %c0_35] : memref<16x32xf32, #tpu.memory_space<vmem>>, vector<2x32xf32>
    tpu.vector_store %arg8[%c2, %c0_35], %171 {strides = array<i32>} : memref<16x32xf32, #tpu.memory_space<vmem>>, vector<2x32xf32>,
    %cst_36 = arith.constant 0.000000e+00 : f32
    %173 = vector.shape_cast %161 : vector<2x1xi1> to vector<2x1xi1>
    %174 = vector.broadcast %173 : vector<2x1xi1> to vector<2x32xi1>
    %175 = vector.broadcast %cst_36 : f32 to vector<2x32xf32>
    %176 = arith.select %174, %164, %175 : vector<2x32xi1>, vector<2x32xf32>
    %c12 = arith.constant 12 : index
    %c0_37 = arith.constant 0 : index
    %177 = vector.load %arg9[%c12, %c0_37] : memref<16x32xf32, #tpu.memory_space<vmem>>, vector<2x32xf32>
    tpu.vector_store %arg9[%c12, %c0_37], %176 {strides = array<i32>} : memref<16x32xf32, #tpu.memory_space<vmem>>, vector<2x32xf32>,
    %178 = vector.extract_strided_slice %5 {offsets = [4, 0], sizes = [2, 128], strides = [1, 1]} : vector<16x256xf32> to vector<2x128xf32>
    %cst_38 = arith.constant dense<0.000000e+00> : vector<2x128xf32>
    %179 = tpu.matmul %128, %7, %cst_38 {dimension_numbers = #tpu.dot_dimension_numbers<[1], [0], [0], [1], [0, 0, 1, 1], [], []>} : vector<2x32xf32>, vector<32x128xf32>, vector<2x128xf32> -> vector<2x128xf32>
    %180 = arith.addf %178, %179 : vector<2x128xf32>
    %181 = vector.extract_strided_slice %180 {offsets = [0, 0], sizes = [2, 32], strides = [1, 1]} : vector<2x128xf32> to vector<2x32xf32>
    %182 = arith.negf %181 : vector<2x32xf32>
    %183 = math.exp %182 : vector<2x32xf32>
    %cst_39 = arith.constant 1.000000e+00 : f32
    %184 = vector.broadcast %cst_39 : f32 to vector<2x32xf32>
    %185 = arith.addf %184, %183 : vector<2x32xf32>
    %186 = arith.divf %184, %185 : vector<2x32xf32>
    %187 = vector.extract_strided_slice %180 {offsets = [0, 32], sizes = [2, 32], strides = [1, 1]} : vector<2x128xf32> to vector<2x32xf32>
    %188 = arith.negf %187 : vector<2x32xf32>
    %189 = math.exp %188 : vector<2x32xf32>
    %cst_40 = arith.constant 1.000000e+00 : f32
    %190 = vector.broadcast %cst_40 : f32 to vector<2x32xf32>
    %191 = arith.addf %190, %189 : vector<2x32xf32>
    %192 = arith.divf %190, %191 : vector<2x32xf32>
    %193 = vector.extract_strided_slice %180 {offsets = [0, 64], sizes = [2, 32], strides = [1, 1]} : vector<2x128xf32> to vector<2x32xf32>
    %194 = math.tanh %193 : vector<2x32xf32>
    %195 = vector.extract_strided_slice %180 {offsets = [0, 96], sizes = [2, 32], strides = [1, 1]} : vector<2x128xf32> to vector<2x32xf32>
    %196 = arith.negf %195 : vector<2x32xf32>
    %197 = math.exp %196 : vector<2x32xf32>
    %cst_41 = arith.constant 1.000000e+00 : f32
    %198 = vector.broadcast %cst_41 : f32 to vector<2x32xf32>
    %199 = arith.addf %198, %197 : vector<2x32xf32>
    %200 = arith.divf %198, %199 : vector<2x32xf32>
    %201 = arith.mulf %192, %131 : vector<2x32xf32>
    %202 = arith.mulf %186, %194 : vector<2x32xf32>
    %203 = arith.addf %201, %202 : vector<2x32xf32>
    %204 = math.tanh %203 : vector<2x32xf32>
    %205 = arith.mulf %200, %204 : vector<2x32xf32>
    %c2_i32 = arith.constant 2 : i32
    %206 = vector.broadcast %c2_i32 : i32 to vector<2x1xi32>
    %207 = arith.cmpi sgt, %9, %206 : vector<2x1xi32>
    %208 = vector.shape_cast %207 : vector<2x1xi1> to vector<2x1xi1>
    %209 = vector.broadcast %208 : vector<2x1xi1> to vector<2x32xi1>
    %210 = arith.select %209, %205, %128 : vector<2x32xi1>, vector<2x32xf32>
    %211 = vector.shape_cast %207 : vector<2x1xi1> to vector<2x1xi1>
    %212 = vector.broadcast %211 : vector<2x1xi1> to vector<2x32xi1>
    %213 = arith.select %212, %203, %131 : vector<2x32xi1>, vector<2x32xf32>
    %214 = vector.extract_strided_slice %5 {offsets = [10, 128], sizes = [2, 128], strides = [1, 1]} : vector<16x256xf32> to vector<2x128xf32>
    %cst_42 = arith.constant dense<0.000000e+00> : vector<2x128xf32>
    %215 = tpu.matmul %164, %8, %cst_42 {dimension_numbers = #tpu.dot_dimension_numbers<[1], [0], [0], [1], [0, 0, 1, 1], [], []>} : vector<2x32xf32>, vector<32x128xf32>, vector<2x128xf32> -> vector<2x128xf32>
    %216 = arith.addf %214, %215 : vector<2x128xf32>
    %217 = vector.extract_strided_slice %216 {offsets = [0, 0], sizes = [2, 32], strides = [1, 1]} : vector<2x128xf32> to vector<2x32xf32>
    %218 = arith.negf %217 : vector<2x32xf32>
    %219 = math.exp %218 : vector<2x32xf32>
    %cst_43 = arith.constant 1.000000e+00 : f32
    %220 = vector.broadcast %cst_43 : f32 to vector<2x32xf32>
    %221 = arith.addf %220, %219 : vector<2x32xf32>
    %222 = arith.divf %220, %221 : vector<2x32xf32>
    %223 = vector.extract_strided_slice %216 {offsets = [0, 32], sizes = [2, 32], strides = [1, 1]} : vector<2x128xf32> to vector<2x32xf32>
    %224 = arith.negf %223 : vector<2x32xf32>
    %225 = math.exp %224 : vector<2x32xf32>
    %cst_44 = arith.constant 1.000000e+00 : f32
    %226 = vector.broadcast %cst_44 : f32 to vector<2x32xf32>
    %227 = arith.addf %226, %225 : vector<2x32xf32>
    %228 = arith.divf %226, %227 : vector<2x32xf32>
    %229 = vector.extract_strided_slice %216 {offsets = [0, 64], sizes = [2, 32], strides = [1, 1]} : vector<2x128xf32> to vector<2x32xf32>
    %230 = math.tanh %229 : vector<2x32xf32>
    %231 = vector.extract_strided_slice %216 {offsets = [0, 96], sizes = [2, 32], strides = [1, 1]} : vector<2x128xf32> to vector<2x32xf32>
    %232 = arith.negf %231 : vector<2x32xf32>
    %233 = math.exp %232 : vector<2x32xf32>
    %cst_45 = arith.constant 1.000000e+00 : f32
    %234 = vector.broadcast %cst_45 : f32 to vector<2x32xf32>
    %235 = arith.addf %234, %233 : vector<2x32xf32>
    %236 = arith.divf %234, %235 : vector<2x32xf32>
    %237 = arith.mulf %228, %167 : vector<2x32xf32>
    %238 = arith.mulf %222, %230 : vector<2x32xf32>
    %239 = arith.addf %237, %238 : vector<2x32xf32>
    %240 = math.tanh %239 : vector<2x32xf32>
    %241 = arith.mulf %236, %240 : vector<2x32xf32>
    %c5_i32 = arith.constant 5 : i32
    %242 = vector.broadcast %c5_i32 : i32 to vector<2x1xi32>
    %243 = arith.cmpi sgt, %9, %242 : vector<2x1xi32>
    %244 = vector.shape_cast %243 : vector<2x1xi1> to vector<2x1xi1>
    %245 = vector.broadcast %244 : vector<2x1xi1> to vector<2x32xi1>
    %246 = arith.select %245, %241, %164 : vector<2x32xi1>, vector<2x32xf32>
    %247 = vector.shape_cast %243 : vector<2x1xi1> to vector<2x1xi1>
    %248 = vector.broadcast %247 : vector<2x1xi1> to vector<2x32xi1>
    %249 = arith.select %248, %239, %167 : vector<2x32xi1>, vector<2x32xf32>
    %cst_46 = arith.constant 0.000000e+00 : f32
    %250 = vector.shape_cast %207 : vector<2x1xi1> to vector<2x1xi1>
    %251 = vector.broadcast %250 : vector<2x1xi1> to vector<2x32xi1>
    %252 = vector.broadcast %cst_46 : f32 to vector<2x32xf32>
    %253 = arith.select %251, %210, %252 : vector<2x32xi1>, vector<2x32xf32>
    %c4 = arith.constant 4 : index
    %c0_47 = arith.constant 0 : index
    %254 = vector.load %arg8[%c4, %c0_47] : memref<16x32xf32, #tpu.memory_space<vmem>>, vector<2x32xf32>
    tpu.vector_store %arg8[%c4, %c0_47], %253 {strides = array<i32>} : memref<16x32xf32, #tpu.memory_space<vmem>>, vector<2x32xf32>,
    %cst_48 = arith.constant 0.000000e+00 : f32
    %255 = vector.shape_cast %243 : vector<2x1xi1> to vector<2x1xi1>
    %256 = vector.broadcast %255 : vector<2x1xi1> to vector<2x32xi1>
    %257 = vector.broadcast %cst_48 : f32 to vector<2x32xf32>
    %258 = arith.select %256, %246, %257 : vector<2x32xi1>, vector<2x32xf32>
    %c10 = arith.constant 10 : index
    %c0_49 = arith.constant 0 : index
    %259 = vector.load %arg9[%c10, %c0_49] : memref<16x32xf32, #tpu.memory_space<vmem>>, vector<2x32xf32>
    tpu.vector_store %arg9[%c10, %c0_49], %258 {strides = array<i32>} : memref<16x32xf32, #tpu.memory_space<vmem>>, vector<2x32xf32>,
    %260 = vector.extract_strided_slice %5 {offsets = [6, 0], sizes = [2, 128], strides = [1, 1]} : vector<16x256xf32> to vector<2x128xf32>
    %cst_50 = arith.constant dense<0.000000e+00> : vector<2x128xf32>
    %261 = tpu.matmul %210, %7, %cst_50 {dimension_numbers = #tpu.dot_dimension_numbers<[1], [0], [0], [1], [0, 0, 1, 1], [], []>} : vector<2x32xf32>, vector<32x128xf32>, vector<2x128xf32> -> vector<2x128xf32>
    %262 = arith.addf %260, %261 : vector<2x128xf32>
    %263 = vector.extract_strided_slice %262 {offsets = [0, 0], sizes = [2, 32], strides = [1, 1]} : vector<2x128xf32> to vector<2x32xf32>
    %264 = arith.negf %263 : vector<2x32xf32>
    %265 = math.exp %264 : vector<2x32xf32>
    %cst_51 = arith.constant 1.000000e+00 : f32
    %266 = vector.broadcast %cst_51 : f32 to vector<2x32xf32>
    %267 = arith.addf %266, %265 : vector<2x32xf32>
    %268 = arith.divf %266, %267 : vector<2x32xf32>
    %269 = vector.extract_strided_slice %262 {offsets = [0, 32], sizes = [2, 32], strides = [1, 1]} : vector<2x128xf32> to vector<2x32xf32>
    %270 = arith.negf %269 : vector<2x32xf32>
    %271 = math.exp %270 : vector<2x32xf32>
    %cst_52 = arith.constant 1.000000e+00 : f32
    %272 = vector.broadcast %cst_52 : f32 to vector<2x32xf32>
    %273 = arith.addf %272, %271 : vector<2x32xf32>
    %274 = arith.divf %272, %273 : vector<2x32xf32>
    %275 = vector.extract_strided_slice %262 {offsets = [0, 64], sizes = [2, 32], strides = [1, 1]} : vector<2x128xf32> to vector<2x32xf32>
    %276 = math.tanh %275 : vector<2x32xf32>
    %277 = vector.extract_strided_slice %262 {offsets = [0, 96], sizes = [2, 32], strides = [1, 1]} : vector<2x128xf32> to vector<2x32xf32>
    %278 = arith.negf %277 : vector<2x32xf32>
    %279 = math.exp %278 : vector<2x32xf32>
    %cst_53 = arith.constant 1.000000e+00 : f32
    %280 = vector.broadcast %cst_53 : f32 to vector<2x32xf32>
    %281 = arith.addf %280, %279 : vector<2x32xf32>
    %282 = arith.divf %280, %281 : vector<2x32xf32>
    %283 = arith.mulf %274, %213 : vector<2x32xf32>
    %284 = arith.mulf %268, %276 : vector<2x32xf32>
    %285 = arith.addf %283, %284 : vector<2x32xf32>
    %286 = math.tanh %285 : vector<2x32xf32>
    %287 = arith.mulf %282, %286 : vector<2x32xf32>
    %c3_i32 = arith.constant 3 : i32
    %288 = vector.broadcast %c3_i32 : i32 to vector<2x1xi32>
    %289 = arith.cmpi sgt, %9, %288 : vector<2x1xi32>
    %290 = vector.shape_cast %289 : vector<2x1xi1> to vector<2x1xi1>
    %291 = vector.broadcast %290 : vector<2x1xi1> to vector<2x32xi1>
    %292 = arith.select %291, %287, %210 : vector<2x32xi1>, vector<2x32xf32>
    %293 = vector.shape_cast %289 : vector<2x1xi1> to vector<2x1xi1>
    %294 = vector.broadcast %293 : vector<2x1xi1> to vector<2x32xi1>
    %295 = arith.select %294, %285, %213 : vector<2x32xi1>, vector<2x32xf32>
    %296 = vector.extract_strided_slice %5 {offsets = [8, 128], sizes = [2, 128], strides = [1, 1]} : vector<16x256xf32> to vector<2x128xf32>
    %cst_54 = arith.constant dense<0.000000e+00> : vector<2x128xf32>
    %297 = tpu.matmul %246, %8, %cst_54 {dimension_numbers = #tpu.dot_dimension_numbers<[1], [0], [0], [1], [0, 0, 1, 1], [], []>} : vector<2x32xf32>, vector<32x128xf32>, vector<2x128xf32> -> vector<2x128xf32>
    %298 = arith.addf %296, %297 : vector<2x128xf32>
    %299 = vector.extract_strided_slice %298 {offsets = [0, 0], sizes = [2, 32], strides = [1, 1]} : vector<2x128xf32> to vector<2x32xf32>
    %300 = arith.negf %299 : vector<2x32xf32>
    %301 = math.exp %300 : vector<2x32xf32>
    %cst_55 = arith.constant 1.000000e+00 : f32
    %302 = vector.broadcast %cst_55 : f32 to vector<2x32xf32>
    %303 = arith.addf %302, %301 : vector<2x32xf32>
    %304 = arith.divf %302, %303 : vector<2x32xf32>
    %305 = vector.extract_strided_slice %298 {offsets = [0, 32], sizes = [2, 32], strides = [1, 1]} : vector<2x128xf32> to vector<2x32xf32>
    %306 = arith.negf %305 : vector<2x32xf32>
    %307 = math.exp %306 : vector<2x32xf32>
    %cst_56 = arith.constant 1.000000e+00 : f32
    %308 = vector.broadcast %cst_56 : f32 to vector<2x32xf32>
    %309 = arith.addf %308, %307 : vector<2x32xf32>
    %310 = arith.divf %308, %309 : vector<2x32xf32>
    %311 = vector.extract_strided_slice %298 {offsets = [0, 64], sizes = [2, 32], strides = [1, 1]} : vector<2x128xf32> to vector<2x32xf32>
    %312 = math.tanh %311 : vector<2x32xf32>
    %313 = vector.extract_strided_slice %298 {offsets = [0, 96], sizes = [2, 32], strides = [1, 1]} : vector<2x128xf32> to vector<2x32xf32>
    %314 = arith.negf %313 : vector<2x32xf32>
    %315 = math.exp %314 : vector<2x32xf32>
    %cst_57 = arith.constant 1.000000e+00 : f32
    %316 = vector.broadcast %cst_57 : f32 to vector<2x32xf32>
    %317 = arith.addf %316, %315 : vector<2x32xf32>
    %318 = arith.divf %316, %317 : vector<2x32xf32>
    %319 = arith.mulf %310, %249 : vector<2x32xf32>
    %320 = arith.mulf %304, %312 : vector<2x32xf32>
    %321 = arith.addf %319, %320 : vector<2x32xf32>
    %322 = math.tanh %321 : vector<2x32xf32>
    %323 = arith.mulf %318, %322 : vector<2x32xf32>
    %c4_i32 = arith.constant 4 : i32
    %324 = vector.broadcast %c4_i32 : i32 to vector<2x1xi32>
    %325 = arith.cmpi sgt, %9, %324 : vector<2x1xi32>
    %326 = vector.shape_cast %325 : vector<2x1xi1> to vector<2x1xi1>
    %327 = vector.broadcast %326 : vector<2x1xi1> to vector<2x32xi1>
    %328 = arith.select %327, %323, %246 : vector<2x32xi1>, vector<2x32xf32>
    %329 = vector.shape_cast %325 : vector<2x1xi1> to vector<2x1xi1>
    %330 = vector.broadcast %329 : vector<2x1xi1> to vector<2x32xi1>
    %331 = arith.select %330, %321, %249 : vector<2x32xi1>, vector<2x32xf32>
    %cst_58 = arith.constant 0.000000e+00 : f32
    %332 = vector.shape_cast %289 : vector<2x1xi1> to vector<2x1xi1>
    %333 = vector.broadcast %332 : vector<2x1xi1> to vector<2x32xi1>
    %334 = vector.broadcast %cst_58 : f32 to vector<2x32xf32>
    %335 = arith.select %333, %292, %334 : vector<2x32xi1>, vector<2x32xf32>
    %c6 = arith.constant 6 : index
    %c0_59 = arith.constant 0 : index
    %336 = vector.load %arg8[%c6, %c0_59] : memref<16x32xf32, #tpu.memory_space<vmem>>, vector<2x32xf32>
    tpu.vector_store %arg8[%c6, %c0_59], %335 {strides = array<i32>} : memref<16x32xf32, #tpu.memory_space<vmem>>, vector<2x32xf32>,
    %cst_60 = arith.constant 0.000000e+00 : f32
    %337 = vector.shape_cast %325 : vector<2x1xi1> to vector<2x1xi1>
    %338 = vector.broadcast %337 : vector<2x1xi1> to vector<2x32xi1>
    %339 = vector.broadcast %cst_60 : f32 to vector<2x32xf32>
    %340 = arith.select %338, %328, %339 : vector<2x32xi1>, vector<2x32xf32>
    %c8 = arith.constant 8 : index
    %c0_61 = arith.constant 0 : index
    %341 = vector.load %arg9[%c8, %c0_61] : memref<16x32xf32, #tpu.memory_space<vmem>>, vector<2x32xf32>
    tpu.vector_store %arg9[%c8, %c0_61], %340 {strides = array<i32>} : memref<16x32xf32, #tpu.memory_space<vmem>>, vector<2x32xf32>,
    %342 = vector.extract_strided_slice %5 {offsets = [8, 0], sizes = [2, 128], strides = [1, 1]} : vector<16x256xf32> to vector<2x128xf32>
    %cst_62 = arith.constant dense<0.000000e+00> : vector<2x128xf32>
    %343 = tpu.matmul %292, %7, %cst_62 {dimension_numbers = #tpu.dot_dimension_numbers<[1], [0], [0], [1], [0, 0, 1, 1], [], []>} : vector<2x32xf32>, vector<32x128xf32>, vector<2x128xf32> -> vector<2x128xf32>
    %344 = arith.addf %342, %343 : vector<2x128xf32>
    %345 = vector.extract_strided_slice %344 {offsets = [0, 0], sizes = [2, 32], strides = [1, 1]} : vector<2x128xf32> to vector<2x32xf32>
    %346 = arith.negf %345 : vector<2x32xf32>
    %347 = math.exp %346 : vector<2x32xf32>
    %cst_63 = arith.constant 1.000000e+00 : f32
    %348 = vector.broadcast %cst_63 : f32 to vector<2x32xf32>
    %349 = arith.addf %348, %347 : vector<2x32xf32>
    %350 = arith.divf %348, %349 : vector<2x32xf32>
    %351 = vector.extract_strided_slice %344 {offsets = [0, 32], sizes = [2, 32], strides = [1, 1]} : vector<2x128xf32> to vector<2x32xf32>
    %352 = arith.negf %351 : vector<2x32xf32>
    %353 = math.exp %352 : vector<2x32xf32>
    %cst_64 = arith.constant 1.000000e+00 : f32
    %354 = vector.broadcast %cst_64 : f32 to vector<2x32xf32>
    %355 = arith.addf %354, %353 : vector<2x32xf32>
    %356 = arith.divf %354, %355 : vector<2x32xf32>
    %357 = vector.extract_strided_slice %344 {offsets = [0, 64], sizes = [2, 32], strides = [1, 1]} : vector<2x128xf32> to vector<2x32xf32>
    %358 = math.tanh %357 : vector<2x32xf32>
    %359 = vector.extract_strided_slice %344 {offsets = [0, 96], sizes = [2, 32], strides = [1, 1]} : vector<2x128xf32> to vector<2x32xf32>
    %360 = arith.negf %359 : vector<2x32xf32>
    %361 = math.exp %360 : vector<2x32xf32>
    %cst_65 = arith.constant 1.000000e+00 : f32
    %362 = vector.broadcast %cst_65 : f32 to vector<2x32xf32>
    %363 = arith.addf %362, %361 : vector<2x32xf32>
    %364 = arith.divf %362, %363 : vector<2x32xf32>
    %365 = arith.mulf %356, %295 : vector<2x32xf32>
    %366 = arith.mulf %350, %358 : vector<2x32xf32>
    %367 = arith.addf %365, %366 : vector<2x32xf32>
    %368 = math.tanh %367 : vector<2x32xf32>
    %369 = arith.mulf %364, %368 : vector<2x32xf32>
    %c4_i32_66 = arith.constant 4 : i32
    %370 = vector.broadcast %c4_i32_66 : i32 to vector<2x1xi32>
    %371 = arith.cmpi sgt, %9, %370 : vector<2x1xi32>
    %372 = vector.shape_cast %371 : vector<2x1xi1> to vector<2x1xi1>
    %373 = vector.broadcast %372 : vector<2x1xi1> to vector<2x32xi1>
    %374 = arith.select %373, %369, %292 : vector<2x32xi1>, vector<2x32xf32>
    %375 = vector.shape_cast %371 : vector<2x1xi1> to vector<2x1xi1>
    %376 = vector.broadcast %375 : vector<2x1xi1> to vector<2x32xi1>
    %377 = arith.select %376, %367, %295 : vector<2x32xi1>, vector<2x32xf32>
    %378 = vector.extract_strided_slice %5 {offsets = [6, 128], sizes = [2, 128], strides = [1, 1]} : vector<16x256xf32> to vector<2x128xf32>
    %cst_67 = arith.constant dense<0.000000e+00> : vector<2x128xf32>
    %379 = tpu.matmul %328, %8, %cst_67 {dimension_numbers = #tpu.dot_dimension_numbers<[1], [0], [0], [1], [0, 0, 1, 1], [], []>} : vector<2x32xf32>, vector<32x128xf32>, vector<2x128xf32> -> vector<2x128xf32>
    %380 = arith.addf %378, %379 : vector<2x128xf32>
    %381 = vector.extract_strided_slice %380 {offsets = [0, 0], sizes = [2, 32], strides = [1, 1]} : vector<2x128xf32> to vector<2x32xf32>
    %382 = arith.negf %381 : vector<2x32xf32>
    %383 = math.exp %382 : vector<2x32xf32>
    %cst_68 = arith.constant 1.000000e+00 : f32
    %384 = vector.broadcast %cst_68 : f32 to vector<2x32xf32>
    %385 = arith.addf %384, %383 : vector<2x32xf32>
    %386 = arith.divf %384, %385 : vector<2x32xf32>
    %387 = vector.extract_strided_slice %380 {offsets = [0, 32], sizes = [2, 32], strides = [1, 1]} : vector<2x128xf32> to vector<2x32xf32>
    %388 = arith.negf %387 : vector<2x32xf32>
    %389 = math.exp %388 : vector<2x32xf32>
    %cst_69 = arith.constant 1.000000e+00 : f32
    %390 = vector.broadcast %cst_69 : f32 to vector<2x32xf32>
    %391 = arith.addf %390, %389 : vector<2x32xf32>
    %392 = arith.divf %390, %391 : vector<2x32xf32>
    %393 = vector.extract_strided_slice %380 {offsets = [0, 64], sizes = [2, 32], strides = [1, 1]} : vector<2x128xf32> to vector<2x32xf32>
    %394 = math.tanh %393 : vector<2x32xf32>
    %395 = vector.extract_strided_slice %380 {offsets = [0, 96], sizes = [2, 32], strides = [1, 1]} : vector<2x128xf32> to vector<2x32xf32>
    %396 = arith.negf %395 : vector<2x32xf32>
    %397 = math.exp %396 : vector<2x32xf32>
    %cst_70 = arith.constant 1.000000e+00 : f32
    %398 = vector.broadcast %cst_70 : f32 to vector<2x32xf32>
    %399 = arith.addf %398, %397 : vector<2x32xf32>
    %400 = arith.divf %398, %399 : vector<2x32xf32>
    %401 = arith.mulf %392, %331 : vector<2x32xf32>
    %402 = arith.mulf %386, %394 : vector<2x32xf32>
    %403 = arith.addf %401, %402 : vector<2x32xf32>
    %404 = math.tanh %403 : vector<2x32xf32>
    %405 = arith.mulf %400, %404 : vector<2x32xf32>
    %c3_i32_71 = arith.constant 3 : i32
    %406 = vector.broadcast %c3_i32_71 : i32 to vector<2x1xi32>
    %407 = arith.cmpi sgt, %9, %406 : vector<2x1xi32>
    %408 = vector.shape_cast %407 : vector<2x1xi1> to vector<2x1xi1>
    %409 = vector.broadcast %408 : vector<2x1xi1> to vector<2x32xi1>
    %410 = arith.select %409, %405, %328 : vector<2x32xi1>, vector<2x32xf32>
    %411 = vector.shape_cast %407 : vector<2x1xi1> to vector<2x1xi1>
    %412 = vector.broadcast %411 : vector<2x1xi1> to vector<2x32xi1>
    %413 = arith.select %412, %403, %331 : vector<2x32xi1>, vector<2x32xf32>
    %cst_72 = arith.constant 0.000000e+00 : f32
    %414 = vector.shape_cast %371 : vector<2x1xi1> to vector<2x1xi1>
    %415 = vector.broadcast %414 : vector<2x1xi1> to vector<2x32xi1>
    %416 = vector.broadcast %cst_72 : f32 to vector<2x32xf32>
    %417 = arith.select %415, %374, %416 : vector<2x32xi1>, vector<2x32xf32>
    %c8_73 = arith.constant 8 : index
    %c0_74 = arith.constant 0 : index
    %418 = vector.load %arg8[%c8_73, %c0_74] : memref<16x32xf32, #tpu.memory_space<vmem>>, vector<2x32xf32>
    tpu.vector_store %arg8[%c8_73, %c0_74], %417 {strides = array<i32>} : memref<16x32xf32, #tpu.memory_space<vmem>>, vector<2x32xf32>,
    %cst_75 = arith.constant 0.000000e+00 : f32
    %419 = vector.shape_cast %407 : vector<2x1xi1> to vector<2x1xi1>
    %420 = vector.broadcast %419 : vector<2x1xi1> to vector<2x32xi1>
    %421 = vector.broadcast %cst_75 : f32 to vector<2x32xf32>
    %422 = arith.select %420, %410, %421 : vector<2x32xi1>, vector<2x32xf32>
    %c6_76 = arith.constant 6 : index
    %c0_77 = arith.constant 0 : index
    %423 = vector.load %arg9[%c6_76, %c0_77] : memref<16x32xf32, #tpu.memory_space<vmem>>, vector<2x32xf32>
    tpu.vector_store %arg9[%c6_76, %c0_77], %422 {strides = array<i32>} : memref<16x32xf32, #tpu.memory_space<vmem>>, vector<2x32xf32>,
    %424 = vector.extract_strided_slice %5 {offsets = [10, 0], sizes = [2, 128], strides = [1, 1]} : vector<16x256xf32> to vector<2x128xf32>
    %cst_78 = arith.constant dense<0.000000e+00> : vector<2x128xf32>
    %425 = tpu.matmul %374, %7, %cst_78 {dimension_numbers = #tpu.dot_dimension_numbers<[1], [0], [0], [1], [0, 0, 1, 1], [], []>} : vector<2x32xf32>, vector<32x128xf32>, vector<2x128xf32> -> vector<2x128xf32>
    %426 = arith.addf %424, %425 : vector<2x128xf32>
    %427 = vector.extract_strided_slice %426 {offsets = [0, 0], sizes = [2, 32], strides = [1, 1]} : vector<2x128xf32> to vector<2x32xf32>
    %428 = arith.negf %427 : vector<2x32xf32>
    %429 = math.exp %428 : vector<2x32xf32>
    %cst_79 = arith.constant 1.000000e+00 : f32
    %430 = vector.broadcast %cst_79 : f32 to vector<2x32xf32>
    %431 = arith.addf %430, %429 : vector<2x32xf32>
    %432 = arith.divf %430, %431 : vector<2x32xf32>
    %433 = vector.extract_strided_slice %426 {offsets = [0, 32], sizes = [2, 32], strides = [1, 1]} : vector<2x128xf32> to vector<2x32xf32>
    %434 = arith.negf %433 : vector<2x32xf32>
    %435 = math.exp %434 : vector<2x32xf32>
    %cst_80 = arith.constant 1.000000e+00 : f32
    %436 = vector.broadcast %cst_80 : f32 to vector<2x32xf32>
    %437 = arith.addf %436, %435 : vector<2x32xf32>
    %438 = arith.divf %436, %437 : vector<2x32xf32>
    %439 = vector.extract_strided_slice %426 {offsets = [0, 64], sizes = [2, 32], strides = [1, 1]} : vector<2x128xf32> to vector<2x32xf32>
    %440 = math.tanh %439 : vector<2x32xf32>
    %441 = vector.extract_strided_slice %426 {offsets = [0, 96], sizes = [2, 32], strides = [1, 1]} : vector<2x128xf32> to vector<2x32xf32>
    %442 = arith.negf %441 : vector<2x32xf32>
    %443 = math.exp %442 : vector<2x32xf32>
    %cst_81 = arith.constant 1.000000e+00 : f32
    %444 = vector.broadcast %cst_81 : f32 to vector<2x32xf32>
    %445 = arith.addf %444, %443 : vector<2x32xf32>
    %446 = arith.divf %444, %445 : vector<2x32xf32>
    %447 = arith.mulf %438, %377 : vector<2x32xf32>
    %448 = arith.mulf %432, %440 : vector<2x32xf32>
    %449 = arith.addf %447, %448 : vector<2x32xf32>
    %450 = math.tanh %449 : vector<2x32xf32>
    %451 = arith.mulf %446, %450 : vector<2x32xf32>
    %c5_i32_82 = arith.constant 5 : i32
    %452 = vector.broadcast %c5_i32_82 : i32 to vector<2x1xi32>
    %453 = arith.cmpi sgt, %9, %452 : vector<2x1xi32>
    %454 = vector.shape_cast %453 : vector<2x1xi1> to vector<2x1xi1>
    %455 = vector.broadcast %454 : vector<2x1xi1> to vector<2x32xi1>
    %456 = arith.select %455, %451, %374 : vector<2x32xi1>, vector<2x32xf32>
    %457 = vector.shape_cast %453 : vector<2x1xi1> to vector<2x1xi1>
    %458 = vector.broadcast %457 : vector<2x1xi1> to vector<2x32xi1>
    %459 = arith.select %458, %449, %377 : vector<2x32xi1>, vector<2x32xf32>
    %460 = vector.extract_strided_slice %5 {offsets = [4, 128], sizes = [2, 128], strides = [1, 1]} : vector<16x256xf32> to vector<2x128xf32>
    %cst_83 = arith.constant dense<0.000000e+00> : vector<2x128xf32>
    %461 = tpu.matmul %410, %8, %cst_83 {dimension_numbers = #tpu.dot_dimension_numbers<[1], [0], [0], [1], [0, 0, 1, 1], [], []>} : vector<2x32xf32>, vector<32x128xf32>, vector<2x128xf32> -> vector<2x128xf32>
    %462 = arith.addf %460, %461 : vector<2x128xf32>
    %463 = vector.extract_strided_slice %462 {offsets = [0, 0], sizes = [2, 32], strides = [1, 1]} : vector<2x128xf32> to vector<2x32xf32>
    %464 = arith.negf %463 : vector<2x32xf32>
    %465 = math.exp %464 : vector<2x32xf32>
    %cst_84 = arith.constant 1.000000e+00 : f32
    %466 = vector.broadcast %cst_84 : f32 to vector<2x32xf32>
    %467 = arith.addf %466, %465 : vector<2x32xf32>
    %468 = arith.divf %466, %467 : vector<2x32xf32>
    %469 = vector.extract_strided_slice %462 {offsets = [0, 32], sizes = [2, 32], strides = [1, 1]} : vector<2x128xf32> to vector<2x32xf32>
    %470 = arith.negf %469 : vector<2x32xf32>
    %471 = math.exp %470 : vector<2x32xf32>
    %cst_85 = arith.constant 1.000000e+00 : f32
    %472 = vector.broadcast %cst_85 : f32 to vector<2x32xf32>
    %473 = arith.addf %472, %471 : vector<2x32xf32>
    %474 = arith.divf %472, %473 : vector<2x32xf32>
    %475 = vector.extract_strided_slice %462 {offsets = [0, 64], sizes = [2, 32], strides = [1, 1]} : vector<2x128xf32> to vector<2x32xf32>
    %476 = math.tanh %475 : vector<2x32xf32>
    %477 = vector.extract_strided_slice %462 {offsets = [0, 96], sizes = [2, 32], strides = [1, 1]} : vector<2x128xf32> to vector<2x32xf32>
    %478 = arith.negf %477 : vector<2x32xf32>
    %479 = math.exp %478 : vector<2x32xf32>
    %cst_86 = arith.constant 1.000000e+00 : f32
    %480 = vector.broadcast %cst_86 : f32 to vector<2x32xf32>
    %481 = arith.addf %480, %479 : vector<2x32xf32>
    %482 = arith.divf %480, %481 : vector<2x32xf32>
    %483 = arith.mulf %474, %413 : vector<2x32xf32>
    %484 = arith.mulf %468, %476 : vector<2x32xf32>
    %485 = arith.addf %483, %484 : vector<2x32xf32>
    %486 = math.tanh %485 : vector<2x32xf32>
    %487 = arith.mulf %482, %486 : vector<2x32xf32>
    %c2_i32_87 = arith.constant 2 : i32
    %488 = vector.broadcast %c2_i32_87 : i32 to vector<2x1xi32>
    %489 = arith.cmpi sgt, %9, %488 : vector<2x1xi32>
    %490 = vector.shape_cast %489 : vector<2x1xi1> to vector<2x1xi1>
    %491 = vector.broadcast %490 : vector<2x1xi1> to vector<2x32xi1>
    %492 = arith.select %491, %487, %410 : vector<2x32xi1>, vector<2x32xf32>
    %493 = vector.shape_cast %489 : vector<2x1xi1> to vector<2x1xi1>
    %494 = vector.broadcast %493 : vector<2x1xi1> to vector<2x32xi1>
    %495 = arith.select %494, %485, %413 : vector<2x32xi1>, vector<2x32xf32>
    %cst_88 = arith.constant 0.000000e+00 : f32
    %496 = vector.shape_cast %453 : vector<2x1xi1> to vector<2x1xi1>
    %497 = vector.broadcast %496 : vector<2x1xi1> to vector<2x32xi1>
    %498 = vector.broadcast %cst_88 : f32 to vector<2x32xf32>
    %499 = arith.select %497, %456, %498 : vector<2x32xi1>, vector<2x32xf32>
    %c10_89 = arith.constant 10 : index
    %c0_90 = arith.constant 0 : index
    %500 = vector.load %arg8[%c10_89, %c0_90] : memref<16x32xf32, #tpu.memory_space<vmem>>, vector<2x32xf32>
    tpu.vector_store %arg8[%c10_89, %c0_90], %499 {strides = array<i32>} : memref<16x32xf32, #tpu.memory_space<vmem>>, vector<2x32xf32>,
    %cst_91 = arith.constant 0.000000e+00 : f32
    %501 = vector.shape_cast %489 : vector<2x1xi1> to vector<2x1xi1>
    %502 = vector.broadcast %501 : vector<2x1xi1> to vector<2x32xi1>
    %503 = vector.broadcast %cst_91 : f32 to vector<2x32xf32>
    %504 = arith.select %502, %492, %503 : vector<2x32xi1>, vector<2x32xf32>
    %c4_92 = arith.constant 4 : index
    %c0_93 = arith.constant 0 : index
    %505 = vector.load %arg9[%c4_92, %c0_93] : memref<16x32xf32, #tpu.memory_space<vmem>>, vector<2x32xf32>
    tpu.vector_store %arg9[%c4_92, %c0_93], %504 {strides = array<i32>} : memref<16x32xf32, #tpu.memory_space<vmem>>, vector<2x32xf32>,
    %506 = vector.extract_strided_slice %5 {offsets = [12, 0], sizes = [2, 128], strides = [1, 1]} : vector<16x256xf32> to vector<2x128xf32>
    %cst_94 = arith.constant dense<0.000000e+00> : vector<2x128xf32>
    %507 = tpu.matmul %456, %7, %cst_94 {dimension_numbers = #tpu.dot_dimension_numbers<[1], [0], [0], [1], [0, 0, 1, 1], [], []>} : vector<2x32xf32>, vector<32x128xf32>, vector<2x128xf32> -> vector<2x128xf32>
    %508 = arith.addf %506, %507 : vector<2x128xf32>
    %509 = vector.extract_strided_slice %508 {offsets = [0, 0], sizes = [2, 32], strides = [1, 1]} : vector<2x128xf32> to vector<2x32xf32>
    %510 = arith.negf %509 : vector<2x32xf32>
    %511 = math.exp %510 : vector<2x32xf32>
    %cst_95 = arith.constant 1.000000e+00 : f32
    %512 = vector.broadcast %cst_95 : f32 to vector<2x32xf32>
    %513 = arith.addf %512, %511 : vector<2x32xf32>
    %514 = arith.divf %512, %513 : vector<2x32xf32>
    %515 = vector.extract_strided_slice %508 {offsets = [0, 32], sizes = [2, 32], strides = [1, 1]} : vector<2x128xf32> to vector<2x32xf32>
    %516 = arith.negf %515 : vector<2x32xf32>
    %517 = math.exp %516 : vector<2x32xf32>
    %cst_96 = arith.constant 1.000000e+00 : f32
    %518 = vector.broadcast %cst_96 : f32 to vector<2x32xf32>
    %519 = arith.addf %518, %517 : vector<2x32xf32>
    %520 = arith.divf %518, %519 : vector<2x32xf32>
    %521 = vector.extract_strided_slice %508 {offsets = [0, 64], sizes = [2, 32], strides = [1, 1]} : vector<2x128xf32> to vector<2x32xf32>
    %522 = math.tanh %521 : vector<2x32xf32>
    %523 = vector.extract_strided_slice %508 {offsets = [0, 96], sizes = [2, 32], strides = [1, 1]} : vector<2x128xf32> to vector<2x32xf32>
    %524 = arith.negf %523 : vector<2x32xf32>
    %525 = math.exp %524 : vector<2x32xf32>
    %cst_97 = arith.constant 1.000000e+00 : f32
    %526 = vector.broadcast %cst_97 : f32 to vector<2x32xf32>
    %527 = arith.addf %526, %525 : vector<2x32xf32>
    %528 = arith.divf %526, %527 : vector<2x32xf32>
    %529 = arith.mulf %520, %459 : vector<2x32xf32>
    %530 = arith.mulf %514, %522 : vector<2x32xf32>
    %531 = arith.addf %529, %530 : vector<2x32xf32>
    %532 = math.tanh %531 : vector<2x32xf32>
    %533 = arith.mulf %528, %532 : vector<2x32xf32>
    %c6_i32_98 = arith.constant 6 : i32
    %534 = vector.broadcast %c6_i32_98 : i32 to vector<2x1xi32>
    %535 = arith.cmpi sgt, %9, %534 : vector<2x1xi32>
    %536 = vector.shape_cast %535 : vector<2x1xi1> to vector<2x1xi1>
    %537 = vector.broadcast %536 : vector<2x1xi1> to vector<2x32xi1>
    %538 = arith.select %537, %533, %456 : vector<2x32xi1>, vector<2x32xf32>
    %539 = vector.shape_cast %535 : vector<2x1xi1> to vector<2x1xi1>
    %540 = vector.broadcast %539 : vector<2x1xi1> to vector<2x32xi1>
    %541 = arith.select %540, %531, %459 : vector<2x32xi1>, vector<2x32xf32>
    %542 = vector.extract_strided_slice %5 {offsets = [2, 128], sizes = [2, 128], strides = [1, 1]} : vector<16x256xf32> to vector<2x128xf32>
    %cst_99 = arith.constant dense<0.000000e+00> : vector<2x128xf32>
    %543 = tpu.matmul %492, %8, %cst_99 {dimension_numbers = #tpu.dot_dimension_numbers<[1], [0], [0], [1], [0, 0, 1, 1], [], []>} : vector<2x32xf32>, vector<32x128xf32>, vector<2x128xf32> -> vector<2x128xf32>
    %544 = arith.addf %542, %543 : vector<2x128xf32>
    %545 = vector.extract_strided_slice %544 {offsets = [0, 0], sizes = [2, 32], strides = [1, 1]} : vector<2x128xf32> to vector<2x32xf32>
    %546 = arith.negf %545 : vector<2x32xf32>
    %547 = math.exp %546 : vector<2x32xf32>
    %cst_100 = arith.constant 1.000000e+00 : f32
    %548 = vector.broadcast %cst_100 : f32 to vector<2x32xf32>
    %549 = arith.addf %548, %547 : vector<2x32xf32>
    %550 = arith.divf %548, %549 : vector<2x32xf32>
    %551 = vector.extract_strided_slice %544 {offsets = [0, 32], sizes = [2, 32], strides = [1, 1]} : vector<2x128xf32> to vector<2x32xf32>
    %552 = arith.negf %551 : vector<2x32xf32>
    %553 = math.exp %552 : vector<2x32xf32>
    %cst_101 = arith.constant 1.000000e+00 : f32
    %554 = vector.broadcast %cst_101 : f32 to vector<2x32xf32>
    %555 = arith.addf %554, %553 : vector<2x32xf32>
    %556 = arith.divf %554, %555 : vector<2x32xf32>
    %557 = vector.extract_strided_slice %544 {offsets = [0, 64], sizes = [2, 32], strides = [1, 1]} : vector<2x128xf32> to vector<2x32xf32>
    %558 = math.tanh %557 : vector<2x32xf32>
    %559 = vector.extract_strided_slice %544 {offsets = [0, 96], sizes = [2, 32], strides = [1, 1]} : vector<2x128xf32> to vector<2x32xf32>
    %560 = arith.negf %559 : vector<2x32xf32>
    %561 = math.exp %560 : vector<2x32xf32>
    %cst_102 = arith.constant 1.000000e+00 : f32
    %562 = vector.broadcast %cst_102 : f32 to vector<2x32xf32>
    %563 = arith.addf %562, %561 : vector<2x32xf32>
    %564 = arith.divf %562, %563 : vector<2x32xf32>
    %565 = arith.mulf %556, %495 : vector<2x32xf32>
    %566 = arith.mulf %550, %558 : vector<2x32xf32>
    %567 = arith.addf %565, %566 : vector<2x32xf32>
    %568 = math.tanh %567 : vector<2x32xf32>
    %569 = arith.mulf %564, %568 : vector<2x32xf32>
    %c1_i32_103 = arith.constant 1 : i32
    %570 = vector.broadcast %c1_i32_103 : i32 to vector<2x1xi32>
    %571 = arith.cmpi sgt, %9, %570 : vector<2x1xi32>
    %572 = vector.shape_cast %571 : vector<2x1xi1> to vector<2x1xi1>
    %573 = vector.broadcast %572 : vector<2x1xi1> to vector<2x32xi1>
    %574 = arith.select %573, %569, %492 : vector<2x32xi1>, vector<2x32xf32>
    %575 = vector.shape_cast %571 : vector<2x1xi1> to vector<2x1xi1>
    %576 = vector.broadcast %575 : vector<2x1xi1> to vector<2x32xi1>
    %577 = arith.select %576, %567, %495 : vector<2x32xi1>, vector<2x32xf32>
    %cst_104 = arith.constant 0.000000e+00 : f32
    %578 = vector.shape_cast %535 : vector<2x1xi1> to vector<2x1xi1>
    %579 = vector.broadcast %578 : vector<2x1xi1> to vector<2x32xi1>
    %580 = vector.broadcast %cst_104 : f32 to vector<2x32xf32>
    %581 = arith.select %579, %538, %580 : vector<2x32xi1>, vector<2x32xf32>
    %c12_105 = arith.constant 12 : index
    %c0_106 = arith.constant 0 : index
    %582 = vector.load %arg8[%c12_105, %c0_106] : memref<16x32xf32, #tpu.memory_space<vmem>>, vector<2x32xf32>
    tpu.vector_store %arg8[%c12_105, %c0_106], %581 {strides = array<i32>} : memref<16x32xf32, #tpu.memory_space<vmem>>, vector<2x32xf32>,
    %cst_107 = arith.constant 0.000000e+00 : f32
    %583 = vector.shape_cast %571 : vector<2x1xi1> to vector<2x1xi1>
    %584 = vector.broadcast %583 : vector<2x1xi1> to vector<2x32xi1>
    %585 = vector.broadcast %cst_107 : f32 to vector<2x32xf32>
    %586 = arith.select %584, %574, %585 : vector<2x32xi1>, vector<2x32xf32>
    %c2_108 = arith.constant 2 : index
    %c0_109 = arith.constant 0 : index
    %587 = vector.load %arg9[%c2_108, %c0_109] : memref<16x32xf32, #tpu.memory_space<vmem>>, vector<2x32xf32>
    tpu.vector_store %arg9[%c2_108, %c0_109], %586 {strides = array<i32>} : memref<16x32xf32, #tpu.memory_space<vmem>>, vector<2x32xf32>,
    %588 = vector.extract_strided_slice %5 {offsets = [14, 0], sizes = [2, 128], strides = [1, 1]} : vector<16x256xf32> to vector<2x128xf32>
    %cst_110 = arith.constant dense<0.000000e+00> : vector<2x128xf32>
    %589 = tpu.matmul %538, %7, %cst_110 {dimension_numbers = #tpu.dot_dimension_numbers<[1], [0], [0], [1], [0, 0, 1, 1], [], []>} : vector<2x32xf32>, vector<32x128xf32>, vector<2x128xf32> -> vector<2x128xf32>
    %590 = arith.addf %588, %589 : vector<2x128xf32>
    %591 = vector.extract_strided_slice %590 {offsets = [0, 0], sizes = [2, 32], strides = [1, 1]} : vector<2x128xf32> to vector<2x32xf32>
    %592 = arith.negf %591 : vector<2x32xf32>
    %593 = math.exp %592 : vector<2x32xf32>
    %cst_111 = arith.constant 1.000000e+00 : f32
    %594 = vector.broadcast %cst_111 : f32 to vector<2x32xf32>
    %595 = arith.addf %594, %593 : vector<2x32xf32>
    %596 = arith.divf %594, %595 : vector<2x32xf32>
    %597 = vector.extract_strided_slice %590 {offsets = [0, 32], sizes = [2, 32], strides = [1, 1]} : vector<2x128xf32> to vector<2x32xf32>
    %598 = arith.negf %597 : vector<2x32xf32>
    %599 = math.exp %598 : vector<2x32xf32>
    %cst_112 = arith.constant 1.000000e+00 : f32
    %600 = vector.broadcast %cst_112 : f32 to vector<2x32xf32>
    %601 = arith.addf %600, %599 : vector<2x32xf32>
    %602 = arith.divf %600, %601 : vector<2x32xf32>
    %603 = vector.extract_strided_slice %590 {offsets = [0, 64], sizes = [2, 32], strides = [1, 1]} : vector<2x128xf32> to vector<2x32xf32>
    %604 = math.tanh %603 : vector<2x32xf32>
    %605 = vector.extract_strided_slice %590 {offsets = [0, 96], sizes = [2, 32], strides = [1, 1]} : vector<2x128xf32> to vector<2x32xf32>
    %606 = arith.negf %605 : vector<2x32xf32>
    %607 = math.exp %606 : vector<2x32xf32>
    %cst_113 = arith.constant 1.000000e+00 : f32
    %608 = vector.broadcast %cst_113 : f32 to vector<2x32xf32>
    %609 = arith.addf %608, %607 : vector<2x32xf32>
    %610 = arith.divf %608, %609 : vector<2x32xf32>
    %611 = arith.mulf %602, %541 : vector<2x32xf32>
    %612 = arith.mulf %596, %604 : vector<2x32xf32>
    %613 = arith.addf %611, %612 : vector<2x32xf32>
    %614 = math.tanh %613 : vector<2x32xf32>
    %615 = arith.mulf %610, %614 : vector<2x32xf32>
    %c7_i32_114 = arith.constant 7 : i32
    %616 = vector.broadcast %c7_i32_114 : i32 to vector<2x1xi32>
    %617 = arith.cmpi sgt, %9, %616 : vector<2x1xi32>
    %618 = vector.shape_cast %617 : vector<2x1xi1> to vector<2x1xi1>
    %619 = vector.broadcast %618 : vector<2x1xi1> to vector<2x32xi1>
    %620 = arith.select %619, %615, %538 : vector<2x32xi1>, vector<2x32xf32>
    %621 = vector.extract_strided_slice %5 {offsets = [0, 128], sizes = [2, 128], strides = [1, 1]} : vector<16x256xf32> to vector<2x128xf32>
    %cst_115 = arith.constant dense<0.000000e+00> : vector<2x128xf32>
    %622 = tpu.matmul %574, %8, %cst_115 {dimension_numbers = #tpu.dot_dimension_numbers<[1], [0], [0], [1], [0, 0, 1, 1], [], []>} : vector<2x32xf32>, vector<32x128xf32>, vector<2x128xf32> -> vector<2x128xf32>
    %623 = arith.addf %621, %622 : vector<2x128xf32>
    %624 = vector.extract_strided_slice %623 {offsets = [0, 0], sizes = [2, 32], strides = [1, 1]} : vector<2x128xf32> to vector<2x32xf32>
    %625 = arith.negf %624 : vector<2x32xf32>
    %626 = math.exp %625 : vector<2x32xf32>
    %cst_116 = arith.constant 1.000000e+00 : f32
    %627 = vector.broadcast %cst_116 : f32 to vector<2x32xf32>
    %628 = arith.addf %627, %626 : vector<2x32xf32>
    %629 = arith.divf %627, %628 : vector<2x32xf32>
    %630 = vector.extract_strided_slice %623 {offsets = [0, 32], sizes = [2, 32], strides = [1, 1]} : vector<2x128xf32> to vector<2x32xf32>
    %631 = arith.negf %630 : vector<2x32xf32>
    %632 = math.exp %631 : vector<2x32xf32>
    %cst_117 = arith.constant 1.000000e+00 : f32
    %633 = vector.broadcast %cst_117 : f32 to vector<2x32xf32>
    %634 = arith.addf %633, %632 : vector<2x32xf32>
    %635 = arith.divf %633, %634 : vector<2x32xf32>
    %636 = vector.extract_strided_slice %623 {offsets = [0, 64], sizes = [2, 32], strides = [1, 1]} : vector<2x128xf32> to vector<2x32xf32>
    %637 = math.tanh %636 : vector<2x32xf32>
    %638 = vector.extract_strided_slice %623 {offsets = [0, 96], sizes = [2, 32], strides = [1, 1]} : vector<2x128xf32> to vector<2x32xf32>
    %639 = arith.negf %638 : vector<2x32xf32>
    %640 = math.exp %639 : vector<2x32xf32>
    %cst_118 = arith.constant 1.000000e+00 : f32
    %641 = vector.broadcast %cst_118 : f32 to vector<2x32xf32>
    %642 = arith.addf %641, %640 : vector<2x32xf32>
    %643 = arith.divf %641, %642 : vector<2x32xf32>
    %644 = arith.mulf %635, %577 : vector<2x32xf32>
    %645 = arith.mulf %629, %637 : vector<2x32xf32>
    %646 = arith.addf %644, %645 : vector<2x32xf32>
    %647 = math.tanh %646 : vector<2x32xf32>
    %648 = arith.mulf %643, %647 : vector<2x32xf32>
    %c0_i32_119 = arith.constant 0 : i32
    %649 = vector.broadcast %c0_i32_119 : i32 to vector<2x1xi32>
    %650 = arith.cmpi sgt, %9, %649 : vector<2x1xi32>
    %651 = vector.shape_cast %650 : vector<2x1xi1> to vector<2x1xi1>
    %652 = vector.broadcast %651 : vector<2x1xi1> to vector<2x32xi1>
    %653 = arith.select %652, %648, %574 : vector<2x32xi1>, vector<2x32xf32>
    %cst_120 = arith.constant 0.000000e+00 : f32
    %654 = vector.shape_cast %617 : vector<2x1xi1> to vector<2x1xi1>
    %655 = vector.broadcast %654 : vector<2x1xi1> to vector<2x32xi1>
    %656 = vector.broadcast %cst_120 : f32 to vector<2x32xf32>
    %657 = arith.select %655, %620, %656 : vector<2x32xi1>, vector<2x32xf32>
    %c14_121 = arith.constant 14 : index
    %c0_122 = arith.constant 0 : index
    %658 = vector.load %arg8[%c14_121, %c0_122] : memref<16x32xf32, #tpu.memory_space<vmem>>, vector<2x32xf32>
    tpu.vector_store %arg8[%c14_121, %c0_122], %657 {strides = array<i32>} : memref<16x32xf32, #tpu.memory_space<vmem>>, vector<2x32xf32>,
    %cst_123 = arith.constant 0.000000e+00 : f32
    %659 = vector.shape_cast %650 : vector<2x1xi1> to vector<2x1xi1>
    %660 = vector.broadcast %659 : vector<2x1xi1> to vector<2x32xi1>
    %661 = vector.broadcast %cst_123 : f32 to vector<2x32xf32>
    %662 = arith.select %660, %653, %661 : vector<2x32xi1>, vector<2x32xf32>
    %c0_124 = arith.constant 0 : index
    %c0_125 = arith.constant 0 : index
    %663 = vector.load %arg9[%c0_124, %c0_125] : memref<16x32xf32, #tpu.memory_space<vmem>>, vector<2x32xf32>
    tpu.vector_store %arg9[%c0_124, %c0_125], %662 {strides = array<i32>} : memref<16x32xf32, #tpu.memory_space<vmem>>, vector<2x32xf32>,
    %c0_126 = arith.constant 0 : index
    %c0_127 = arith.constant 0 : index
    %664 = vector.load %arg5[%c0_126, %c0_127] : memref<64x128xf32, #tpu.memory_space<vmem>>, vector<64x128xf32>
    %c0_128 = arith.constant 0 : index
    %c0_129 = arith.constant 0 : index
    %665 = vector.load %arg8[%c0_128, %c0_129] : memref<16x32xf32, #tpu.memory_space<vmem>>, vector<16x32xf32>
    %666 = vector.extract_strided_slice %664 {offsets = [0, 0], sizes = [32, 128], strides = [1, 1]} : vector<64x128xf32> to vector<32x128xf32>
    %cst_130 = arith.constant dense<0.000000e+00> : vector<16x128xf32>
    %667 = tpu.matmul %665, %666, %cst_130 {dimension_numbers = #tpu.dot_dimension_numbers<[1], [0], [0], [1], [0, 0, 1, 1], [], []>} : vector<16x32xf32>, vector<32x128xf32>, vector<16x128xf32> -> vector<16x128xf32>
    %c0_131 = arith.constant 0 : index
    %c0_132 = arith.constant 0 : index
    %668 = vector.load %arg9[%c0_131, %c0_132] : memref<16x32xf32, #tpu.memory_space<vmem>>, vector<16x32xf32>
    %669 = vector.extract_strided_slice %664 {offsets = [32, 0], sizes = [32, 128], strides = [1, 1]} : vector<64x128xf32> to vector<32x128xf32>
    %cst_133 = arith.constant dense<0.000000e+00> : vector<16x128xf32>
    %670 = tpu.matmul %668, %669, %cst_133 {dimension_numbers = #tpu.dot_dimension_numbers<[1], [0], [0], [1], [0, 0, 1, 1], [], []>} : vector<16x32xf32>, vector<32x128xf32>, vector<16x128xf32> -> vector<16x128xf32>
    %671 = arith.addf %667, %670 : vector<16x128xf32>
    %c0_134 = arith.constant 0 : index
    %c0_135 = arith.constant 0 : index
    %672 = vector.load %arg6[%c0_134, %c0_135] : memref<1x128xf32, #tpu.memory_space<vmem>>, vector<1x128xf32>
    %673 = vector.broadcast %672 : vector<1x128xf32> to vector<16x128xf32>
    %674 = arith.addf %671, %673 : vector<16x128xf32>
    %cst_136 = arith.constant dense<0xFF800000> : vector<16xf32>
    %675 = vector.multi_reduction <maximumf>, %674, %cst_136 [1] : vector<16x128xf32> to vector<16xf32>
    %676 = vector.shape_cast %675 : vector<16xf32> to vector<16x1xf32>
    %677 = vector.broadcast %676 : vector<16x1xf32> to vector<16x128xf32>
    %678 = arith.subf %674, %677 : vector<16x128xf32>
    %679 = math.exp %678 : vector<16x128xf32>
    %cst_137 = arith.constant dense<0.000000e+00> : vector<16xf32>
    %680 = vector.multi_reduction <add>, %679, %cst_137 [1] : vector<16x128xf32> to vector<16xf32>
    %681 = vector.shape_cast %680 : vector<16xf32> to vector<16x1xf32>
    %682 = math.log %681 : vector<16x1xf32>
    %683 = vector.broadcast %682 : vector<16x1xf32> to vector<16x128xf32>
    %684 = arith.subf %678, %683 : vector<16x128xf32>
    %c0_138 = arith.constant 0 : index
    %c0_139 = arith.constant 0 : index
    %685 = vector.load %arg7[%c0_138, %c0_139] : memref<16x128xf32, #tpu.memory_space<vmem>>, vector<16x128xf32>
    tpu.vector_store %arg7[%c0_138, %c0_139], %684 {strides = array<i32>} : memref<16x128xf32, #tpu.memory_space<vmem>>, vector<16x128xf32>,
    return
  }
}

</mosaic_0001>

<bundles_post_ra>
// kernel: model_forward.1
= control target key start
LH: loop header
LB: loop body
LE: loop exit
PB: predicated region body
PF: predicated region fallthrough
CT: control target
= control target key end

     0   :  { %v2864_v3 = vmov 0.0|0.0   ;;  %v2865_v4 = vmov 0.0   ;;  %vm2866_vm0 = vmmov 0   ;;  %vm48_vm1 = vcmask 261120   ;;  %s2869_s15 = smov 32   ;;  %s3483_s2 = inlined_call_operand.vmem [shape: f32[32,256], index: 2, kind: input, shape index: {}]   ;;  %s3484_s3 = inlined_call_operand.vmem [shape: f32[32,256], index: 3, kind: input, shape index: {}]   ;;  %s3485_s0 = inlined_call_operand.vmem [shape: f32[16,32], index: 0, kind: input, shape index: {}]   ;;  %s3486_s4 = inlined_call_operand.vmem [shape: f32[1,256], index: 4, kind: input, shape index: {}]   ;;  %s3487_s1 = inlined_call_operand.vmem [shape: s32[2,1], index: 1, kind: input, shape index: {}]   ;;  %s3488_s5 = inlined_call_operand.vmem [shape: f32[64,128], index: 5, kind: input, shape index: {}]   ;;  %s3489_s6 = inlined_call_operand.vmem [shape: f32[1,128], index: 6, kind: input, shape index: {}]   ;;  %s3490_s7 = inlined_call_operand.vmem [shape: f32[16,128], index: 7, kind: output, shape index: {}]  }
   0x1   :  { %v29_v0 = vld [vmem:[%s3483_s2 + $0x8] sm:$0xff]  ;;  %v31_v1 = vld [vmem:[%s3483_s2 + $0x18] sm:$0xff]  ;;  %v28_v2 = vld [vmem:[%s3483_s2] sm:$0xff]  ;;  %2605 = vmatprep.subr.bf16.mxu1 %v2864_v3  ;;  %119 = vmatprep.mubr.f32.mxu0 %v2865_v4  ;;  %v38_v28 = vlaneseq  ;;  %v2867_v50 = vmov 0   ;;  %vm367_vm5 = vcmask 254976  }
   0x2   :  { %v2597_v5 = vpack.c.bf16 %v31_v1, %v29_v0  ;;  %v30_v6 = vld [vmem:[%s3483_s2 + $0x10] sm:$0xff]  ;;  %v33_v7 = vld [vmem:[%s3483_s2 + $0x28] sm:$0xff]  ;;  %v35_v8 = vld [vmem:[%s3483_s2 + $0x38] sm:$0xff]  ;;  %2407 = vmatprep.mubr.msk.f32.mxu1 %vm2866_vm0, %v2865_v4  ;;  %2726 = vset.pattern.permute.xlu1 %v2867_v50 }
   0x3   :  { %v2599_v9 = vpack.c.bf16 %v30_v6, %v28_v2  ;;  %v2601_v10 = vpack.c.bf16 %v35_v8, %v33_v7  ;;  %v132_v11 = vld [vmem:[%s3484_s3] sm:$0xff]  ;;  %v134_v12 = vld [vmem:[%s3484_s3 + $0x10] sm:$0xff]  ;;  %v133_v20 = vld [vmem:[%s3484_s3 + $0x8] sm:$0xff]  ;;  %v39_v29 = vshrl.u32 %v38_v28, 7  ;;  %2727 = vset.pattern.permute.xlu0 %v2867_v50 }
   0x4   :  { %v32_v13 = vld [vmem:[%s3483_s2 + $0x20] sm:$0xff]  ;;  %2598 = vmatprep.subr.bf16.mxu0 %v2597_v5  ;;  %v2942_v14 = vpack.c.bf16 %v134_v12, %v132_v11  ;;  %v34_v15 = vld [vmem:[%s3483_s2 + $0x30] sm:$0xff]  ;;  %v135_v21 = vld [vmem:[%s3484_s3 + $0x18] sm:$0xff] }
   0x5   :  { %v136_v16 = vld [vmem:[%s3484_s3 + $0x20] sm:$0xff]  ;;  %2600 = vmatpush1.bf16.msra.mxu0 %v2599_v9  ;;  %v2603_v17 = vpack.c.bf16 %v34_v15, %v32_v13  ;;  %v138_v18 = vld [vmem:[%s3484_s3 + $0x30] sm:$0xff]  ;;  %v2966_v23 = vpack.c.bf16 %v135_v21, %v133_v20  ;;  %v137_v24 = vld [vmem:[%s3484_s3 + $0x28] sm:$0xff]  ;;  %v44_v30 = vsub.s32 1, %v39_v29  ;;  %v40_v33 = vsub.s32 0, %v39_v29 }
   0x6   :  { %2602 = vmatprep.subr.bf16.mxu0 %v2601_v10  ;;  %2607 = vmatpush3.bf16.msra.mxu1 %v2942_v14  ;;  %v2954_v19 = vpack.c.bf16 %v138_v18, %v136_v16  ;;  %v26_v22 = vld [vmem:[%s3485_s0] sm:$0xff]  ;;  %v139_v25 = vld [vmem:[%s3484_s3 + $0x38] sm:$0xff]  ;;  %v27_v26 = vld [vmem:[%s3485_s0 + $0x8] sm:$0xff] }
   0x7   :  { %2608 = vmatprep.subr.bf16.mxu1 %v2864_v3  ;;  %v2983_v27 = vpack.c.bf16 %v139_v25, %v137_v24  ;;  %v36_v31 = vld [vmem:[%s3486_s4] sm:$0x3]  ;;  %s2868_s4 = smov 64  }
   0x8   :  { %v45_v32 = vrot.slane %v36_v31, %v44_v30  ;;  %v41_v38 = vrot.slane %v36_v31, %v40_v33  ;;  %v3025_v62 = vld [vmem:[%s3487_s1] sm:$0x3]  ;;  %s2870_s1 = smov 96  }
   0x9   :  { %2604 = vmatpush1.bf16.msra.mxu0 %v2603_v17  ;;  %vm239_vm2 = vcmp.gt.s32.totalorder %v3025_v62, 0  ;;  %vm345_vm3 = vcmp.gt.s32.totalorder %v3025_v62, 7  ;;  %vm600_vm7 = vcmp.gt.s32.totalorder %v3025_v62, 6  ;;  %vm473_vm8 = vcmp.gt.s32.totalorder %v3025_v62, 1 }
   0xa   :  { %2610 = vmatpush3.bf16.msra.mxu1 %v2954_v19  ;;  %2611 = vmatprep.subr.bf16.mxu0 %v2864_v3  ;;  %v240_v2 = vsel %vm239_vm2, 1, %v2867_v50  ;;  %v346_v5 = vsel %vm345_vm3, 1, %v2867_v50  ;;  %vm852_vm11 = vcmp.gt.s32.totalorder %v3025_v62, 5  ;;  %vm728_vm12 = vcmp.gt.s32.totalorder %v3025_v62, 2 }
   0xb   :  { %2617 = vmatprep.subr.bf16.mxu1 %v2864_v3  ;;  %vm1100_vm15 = vcmp.gt.s32.totalorder %v3025_v62, 4  ;;  %vm980_vm2 = vcmp.gt.s32.totalorder %v3025_v62, 3 }
   0xc   :  { %2270 = vmatmul.mubr.msk.f32.vlgmr.msra.gmra.mrb[0].mxu0 %vm48_vm1, %v26_v22 }
   0xd   :  { %2613 = vmatpush3.bf16.msra.mxu0 %v2966_v23  ;;  %125 = vmatprep.mubr.f32.mxu0 %v2865_v4 }
   0xe   :  { %2408 = vmatmul.mubr.f32.vlgmr.msra.gmra.mrb[0].mxu1 %v2865_v4  ;;  %2614 = vmatprep.subr.bf16.mxu0 %v2864_v3 }
   0xf   :  { %2619 = vmatpush3.bf16.msra.mxu1 %v2942_v14  ;;  %2429 = vmatprep.mubr.msk.f32.mxu1 %vm2866_vm0, %v2865_v4 }
  0x10   :  { %2271 = vmatmul.mubr.msk.f32.gmra.mrb[2].mxu0 %vm48_vm1, %v27_v26  ;;  %2620 = vmatprep.subr.bf16.mxu1 %v2864_v3 }
  0x11   :  { %2616 = vmatpush3.bf16.msra.mxu0 %v2983_v27  ;;  %2418 = vmatprep.mubr.msk.f32.mxu0 %vm2866_vm0, %v2865_v4 }
  0x12   :  { %2623 = vmatprep.subr.bf16.mxu0 %v2864_v3 }
  0x13   :  { %2622 = vmatpush3.bf16.msra.mxu1 %v2954_v19 }
  0x14   :  { %2419 = vmatmul.mubr.f32.vlgmr.msra.gmra.mrb[4].mxu0 %v2865_v4  ;;  %2629 = vmatprep.subr.bf16.mxu1 %v2864_v3 }
  0x15   :  { %2625 = vmatpush3.bf16.msra.mxu0 %v2966_v23  ;;  %2440 = vmatprep.mubr.msk.f32.mxu0 %vm2866_vm0, %v2865_v4 }
  0x16   :  { %2626 = vmatprep.subr.bf16.mxu0 %v2864_v3 }
  0x19   :  { %2628 = vmatpush3.bf16.msra.mxu0 %v2983_v27 }
  0x1a   :  { %2635 = vmatprep.subr.bf16.mxu0 %v2864_v3 }
  0xdf   :  { %v121_v34 = vpop.f32.mrb[0].mxu0 }
  0xe0   :  { %v123_v35 = vpop.f32.mrb[1].mxu0  ;;  %v3012_v44 = vadd.f32 %v121_v34, %v41_v38 }
  0xe1   :  { %v3008_v36 = vadd.f32 %v123_v35, %v45_v32  ;;  %v210_v37 = vpop.f32.mrb[0].mxu1 }
  0xe2   :  { %v2409_v39 = vpop.f32.mrb[1].mxu1  ;;  %v214_v49 = vadd.f32 %v210_v37, %v3012_v44 }
  0xe3   :  { %v127_v40 = vpop.f32.mrb[2].mxu0 }
  0xe4   :  { %v3010_v41 = vadd.f32 %v127_v40, %v41_v38  ;;  %v129_v42 = vpop.f32.mrb[3].mxu0  ;;  %v2272_v54 = vmul.f32 -1.442695, %v214_v49 }
  0xe5   :  { %v3014_v45 = vadd.f32 %v129_v42, %v45_v32 }
  0xe7   :  { %v313_v43 = vpop.f32.mrb[4].mxu0 }
  0xe8   :  { %v318_v46 = vrot.slane %v313_v43, 2  ;;  %v2420_v47 = vpop.f32.mrb[5].mxu0 }
  0xea   :  { %v320_v48 = vadd.f32 %v318_v46, %v3014_v45 }
  0xec   :  { %2728 = vtanh.f32 %v320_v48  ;;  %v2273_v53 = vmul.f32 -1.442695, %v320_v48 }
  0xed   :  { %2730 = vtanh.f32 %v214_v49 }
  0xee   :  { %2732 = vpow2.f32 %v2273_v53 }
  0xef   :  { %2734 = vpow2.f32 %v2272_v54 }
  0xf6   :  { %v2729_v51 = vpop.eup %2728 }
  0xf7   :  { %330 = vrot.lane.b32.xlu0 %v2729_v51, %s2868_s4  ;;  %v2731_v52 = vpop.eup %2730 }
  0xf8   :  { %v2733_v55 = vpop.eup %2732 }
  0xf9   :  { %v324_v56 = vadd.f32 1.0, %v2733_v55  ;;  %v2735_v57 = vpop.eup %2734 }
  0xfa   :  { %v218_v58 = vadd.f32 1.0, %v2735_v57 }
  0xfb   :  { %224 = vrot.lane.b32.xlu0 %v2731_v52, %s2868_s4  ;;  %2736 = vrcp.f32 %v324_v56 }
  0xfc   :  { %2738 = vrcp.f32 %v218_v58 }
 0x105   :  { %v2737_v59 = vpop.eup %2736 }
 0x106   :  { %v2739_v63 = vpop.eup %2738  ;;  %v328_v6 = vmul.f32 0.0, %v2737_v59 }
 0x107   :  { %v222_v9 = vmul.f32 0.0, %v2739_v63 }
 0x169   :  { %v331_v60 = vpop.permute.xlu0 %330 }
 0x16a   :  { %v333_v61 = vmul.f32 %v2737_v59, %v331_v60 }
 0x16c   :  { %335 = vrot.lane.b32.xlu1 %v333_v61, %s2869_s15 }
 0x16d   :  { %v225_v0 = vpop.permute.xlu0 %224 }
 0x16e   :  { %v227_v1 = vmul.f32 %v2739_v63, %v225_v0 }
 0x170   :  { %229 = vrot.lane.b32.xlu1 %v227_v1, %s2869_s15 }
 0x174   :  { %242 = vperm.xlu1 %2726, %v240_v2  }
 0x178   :  { %348 = vperm.xlu1 %2726, %v346_v5  }
 0x1de   :  { %v336_v7 = vpop.permute.xlu1 %335 }
 0x1df   :  { %v338_v8 = vadd.f32 %v336_v7, %v328_v6 }
 0x1e1   :  { %2740 = vtanh.f32 %v338_v8  ;;  %v358_v22 = vrot.slane %v338_v8, 6 }
 0x1e2   :  { %v230_v10 = vpop.permute.xlu1 %229 }
 0x1e3   :  { %v3033_v11 = vadd.f32 %v230_v10, %v222_v9  ;;  %v601_v9 = vsel %vm600_vm7, 1, %v2867_v50 }
 0x1e5   :  { %2742 = vtanh.f32 %v3033_v11 }
 0x1eb   :  { %v2741_v12 = vpop.eup %2740 }
 0x1ec   :  { %341 = vrot.lane.b32.xlu0 %v2741_v12, %s2868_s4 }
 0x1ef   :  { %v2743_v13 = vpop.eup %2742 }
 0x1f0   :  { %235 = vrot.lane.b32.xlu0 %v2743_v13, %s2868_s4 }
 0x1f3   :  { %v3038_v17 = vpop.permute.xlu1 %242 }
 0x1f4   :  { %vm244_vm4 = vcmp.eq.s32.totalorder %v3038_v17, 1  ;;  %v2063_v17 = vld [vmem:[%s3488_s5 + $0x10] sm:$0xff] }
 0x1f5   :  { %v3090_v61 = vsel %vm244_vm4, %v3033_v11, 0.0  ;;  %v474_v11 = vsel %vm473_vm8, 1, %v2867_v50 }
 0x1f6   :  { %v454_v1 = vrot.slane %v3090_v61, 6 }
 0x1f7   :  { %v3046_v25 = vpop.permute.xlu1 %348 }
 0x1f8   :  { %vm350_vm6 = vcmp.eq.s32.totalorder %v3046_v25, 1 }
 0x25e   :  { %v342_v15 = vpop.permute.xlu0 %341 }
 0x25f   :  { %v344_v16 = vmul.f32 %v2737_v59, %v342_v15 }
 0x261   :  { %v352_v18 = vrot.slane %v344_v16, 6 }
 0x262   :  { %v236_v20 = vpop.permute.xlu0 %235 }
 0x263   :  { %v238_v21 = vmul.f32 %v2739_v63, %v236_v20  ;;  %353 = vrot.lane.b32.xlu0 %v352_v18, %s2869_s15 }
 0x265   :  { %v245_v24 = vsel %vm244_vm4, %v238_v21, 0.0 }
 0x266   :  { %364 = vrot.lane.b32.xlu1 %v245_v24, %s2869_s15 }
 0x267   :  { %359 = vrot.lane.b32.xlu0 %v358_v22, %s2870_s1 }
 0x2d5   :  { %v354_v26 = vpop.permute.xlu0 %353 }
 0x2d6   :  { %v3051_v28 = vsel %vm350_vm6, %v354_v26, 0.0 }
 0x2d7   :  { %369 = vst.msk [vmem:[#allocation3 + $0xe] sm:$0x3] %vm367_vm5, %v3051_v28  ;;  %2441 = vmatmul.mubr.msk.f32.vlgmr.msra.gmra.mrb[6].mxu0 %vm48_vm1, %v3051_v28 }
 0x2d8   :  { %v3057_v29 = vpop.permute.xlu1 %364  ;;  %2637 = vmatpush3.bf16.msra.mxu0 %v2966_v23  ;;  %2462 = vmatprep.mubr.msk.f32.mxu0 %vm2866_vm0, %v2865_v4 }
 0x2d9   :  { %368 = vst.msk [vmem:[#allocation2] sm:$0x3] %vm367_vm5, %v3057_v29  ;;  %2430 = vmatmul.mubr.msk.f32.vlgmr.msra.gmra.mrb[2].mxu1 %vm48_vm1, %v3057_v29  ;;  %2638 = vmatprep.subr.bf16.mxu0 %v2864_v3  ;;  %v360_v39 = vpop.permute.xlu0 %359 }
 0x2da   :  { %2631 = vmatpush3.bf16.msra.mxu1 %v2942_v14  ;;  %2451 = vmatprep.mubr.msk.f32.mxu1 %vm2866_vm0, %v2865_v4  ;;  %v3079_v42 = vsel %vm350_vm6, %v360_v39, 0.0 }
 0x2db   :  { %2632 = vmatprep.subr.bf16.mxu1 %v2864_v3  ;;  %v579_v46 = vrot.slane %v3079_v42, 4 }
 0x2dc   :  { %2640 = vmatpush3.bf16.msra.mxu0 %v2983_v27 }
 0x2dd   :  { %2647 = vmatprep.subr.bf16.mxu0 %v2864_v3 }
 0x2de   :  { %2634 = vmatpush3.bf16.msra.mxu1 %v2954_v19 }
 0x2df   :  { %2641 = vmatprep.subr.bf16.mxu1 %v2864_v3 }
 0x3aa   :  { %v563_v30 = vpop.f32.mrb[6].mxu0 }
 0x3ab   :  { %v568_v31 = vrot.slane %v563_v30, 4  ;;  %v2442_v32 = vpop.f32.mrb[7].mxu0 }
 0x3ac   :  { %v438_v33 = vpop.f32.mrb[2].mxu1 }
 0x3ad   :  { %v570_v34 = vadd.f32 %v568_v31, %v3014_v45  ;;  %v443_v35 = vrot.slane %v438_v33, 6  ;;  %v2431_v37 = vpop.f32.mrb[3].mxu1 }
 0x3af   :  { %2744 = vtanh.f32 %v570_v34  ;;  %v445_v38 = vadd.f32 %v443_v35, %v3012_v44  ;;  %v2277_v47 = vmul.f32 -1.442695, %v570_v34 }
 0x3b1   :  { %2746 = vtanh.f32 %v445_v38  ;;  %v2275_v48 = vmul.f32 -1.442695, %v445_v38 }
 0x3b2   :  { %2748 = vpow2.f32 %v2277_v47 }
 0x3b3   :  { %2750 = vpow2.f32 %v2275_v48 }
 0x3b9   :  { %v2745_v40 = vpop.eup %2744 }
 0x3ba   :  { %585 = vrot.lane.b32.xlu1 %v2745_v40, %s2868_s4 }
 0x3bb   :  { %v2747_v43 = vpop.eup %2746 }
 0x3bc   :  { %458 = vrot.lane.b32.xlu0 %v2747_v43, %s2868_s4  ;;  %v2749_v49 = vpop.eup %2748 }
 0x3bd   :  { %v2751_v51 = vpop.eup %2750  ;;  %v574_v52 = vadd.f32 1.0, %v2749_v49 }
 0x3be   :  { %580 = vrot.lane.b32.xlu1 %v579_v46, %s2869_s15  ;;  %v449_v53 = vadd.f32 1.0, %v2751_v51 }
 0x3bf   :  { %2752 = vrcp.f32 %v574_v52 }
 0x3c0   :  { %2754 = vrcp.f32 %v449_v53 }
 0x3c9   :  { %v2753_v54 = vpop.eup %2752 }
 0x3ca   :  { %v2755_v57 = vpop.eup %2754 }
 0x3cb   :  { %v456_v5 = vmul.f32 %v2755_v57, %v454_v1 }
 0x42c   :  { %v586_v55 = vpop.permute.xlu1 %585 }
 0x42d   :  { %v588_v56 = vmul.f32 %v2753_v54, %v586_v55 }
 0x42e   :  { %v459_v58 = vpop.permute.xlu0 %458 }
 0x42f   :  { %590 = vrot.lane.b32.xlu0 %v588_v56, %s2869_s15  ;;  %v461_v59 = vmul.f32 %v2755_v57, %v459_v58 }
 0x430   :  { %v581_v60 = vpop.permute.xlu1 %580 }
 0x431   :  { %463 = vrot.lane.b32.xlu1 %v461_v59, %s2869_s15  ;;  %v583_v63 = vmul.f32 %v2753_v54, %v581_v60 }
 0x4a1   :  { %v591_v0 = vpop.permute.xlu0 %590 }
 0x4a2   :  { %v593_v2 = vadd.f32 %v591_v0, %v583_v63 }
 0x4a3   :  { %v464_v6 = vpop.permute.xlu1 %463 }
 0x4a4   :  { %2756 = vtanh.f32 %v593_v2  ;;  %v466_v7 = vadd.f32 %v464_v6, %v456_v5  ;;  %v613_v21 = vrot.slane %v593_v2, 4 }
 0x4a6   :  { %2758 = vtanh.f32 %v466_v7  ;;  %v486_v22 = vrot.slane %v466_v7, 2 }
 0x4ae   :  { %v2757_v8 = vpop.eup %2756 }
 0x4af   :  { %596 = vrot.lane.b32.xlu0 %v2757_v8, %s2868_s4 }
 0x4b0   :  { %v2759_v10 = vpop.eup %2758 }
 0x4b1   :  { %469 = vrot.lane.b32.xlu1 %v2759_v10, %s2868_s4 }
 0x4b3   :  { %603 = vperm.xlu0 %2727, %v601_v9  }
 0x4b5   :  { %476 = vperm.xlu1 %2726, %v474_v11  }
 0x521   :  { %v597_v12 = vpop.permute.xlu0 %596 }
 0x522   :  { %v599_v13 = vmul.f32 %v2753_v54, %v597_v12 }
 0x523   :  { %v470_v16 = vpop.permute.xlu1 %469 }
 0x524   :  { %v607_v15 = vrot.slane %v599_v13, 4  ;;  %v472_v18 = vmul.f32 %v2755_v57, %v470_v16 }
 0x526   :  { %608 = vrot.lane.b32.xlu1 %v607_v15, %s2869_s15  ;;  %v480_v20 = vrot.slane %v472_v18, 2  ;;  %v853_v18 = vsel %vm852_vm11, 1, %v2867_v50 }
 0x528   :  { %481 = vrot.lane.b32.xlu0 %v480_v20, %s2869_s15 }
 0x52a   :  { %614 = vrot.lane.b32.xlu1 %v613_v21, %s2870_s1  ;;  %v729_v21 = vsel %vm728_vm12, 1, %v2867_v50 }
 0x52e   :  { %487 = vrot.lane.b32.xlu1 %v486_v22, %s2870_s1 }
 0x532   :  { %v3103_v24 = vpop.permute.xlu0 %603 }
 0x533   :  { %vm605_vm9 = vcmp.eq.s32.totalorder %v3103_v24, 1 }
 0x534   :  { %v3105_v26 = vpop.permute.xlu1 %476 }
 0x535   :  { %vm478_vm10 = vcmp.eq.s32.totalorder %v3105_v26, 1 }
 0x598   :  { %v609_v30 = vpop.permute.xlu1 %608 }
 0x599   :  { %v3111_v31 = vsel %vm605_vm9, %v609_v30, %v3051_v28  ;;  %v620_v32 = vsel %vm605_vm9, %v609_v30, 0.0 }
 0x59a   :  { %621 = vst.msk [vmem:[#allocation3 + $0xc] sm:$0x3] %vm367_vm5, %v620_v32  ;;  %2463 = vmatmul.mubr.msk.f32.vlgmr.msra.gmra.mrb[8].mxu0 %vm48_vm1, %v3111_v31  ;;  %v482_v33 = vpop.permute.xlu0 %481 }
 0x59b   :  { %2649 = vmatpush3.bf16.msra.mxu0 %v2966_v23  ;;  %2484 = vmatprep.mubr.msk.f32.mxu0 %vm2866_vm0, %v2865_v4  ;;  %v3125_v28 = vsel %vm478_vm10, %v482_v33, %v3057_v29  ;;  %v618_v34 = vsel %vm478_vm10, %v482_v33, 0.0 }
 0x59c   :  { %2650 = vmatprep.subr.bf16.mxu0 %v2864_v3  ;;  %619 = vst.msk [vmem:[#allocation2 + $0x2] sm:$0x3] %vm367_vm5, %v618_v34  ;;  %2452 = vmatmul.mubr.msk.f32.vlgmr.msra.gmra.mrb[4].mxu1 %vm48_vm1, %v3125_v28  ;;  %v615_v48 = vpop.permute.xlu1 %614 }
 0x59d   :  { %2643 = vmatpush3.bf16.msra.mxu1 %v2942_v14  ;;  %2473 = vmatprep.mubr.msk.f32.mxu1 %vm2866_vm0, %v2865_v4  ;;  %v3147_v51 = vsel %vm605_vm9, %v615_v48, %v3079_v42 }
 0x59e   :  { %2644 = vmatprep.subr.bf16.mxu1 %v2864_v3  ;;  %v831_v52 = vrot.slane %v3147_v51, 6 }
 0x59f   :  { %2652 = vmatpush3.bf16.msra.mxu0 %v2983_v27 }
 0x5a0   :  { %2659 = vmatprep.subr.bf16.mxu0 %v2864_v3  ;;  %v488_v42 = vpop.permute.xlu1 %487 }
 0x5a1   :  { %2646 = vmatpush3.bf16.msra.mxu1 %v2954_v19 }
 0x5a2   :  { %2653 = vmatprep.subr.bf16.mxu1 %v2864_v3 }
 0x66d   :  { %v815_v29 = vpop.f32.mrb[8].mxu0 }
 0x66e   :  { %v820_v35 = vrot.slane %v815_v29, 6  ;;  %v2464_v37 = vpop.f32.mrb[9].mxu0 }
 0x66f   :  { %v691_v39 = vpop.f32.mrb[4].mxu1 }
 0x670   :  { %v822_v38 = vadd.f32 %v820_v35, %v3014_v45  ;;  %v696_v40 = vrot.slane %v691_v39, 4  ;;  %v2453_v43 = vpop.f32.mrb[5].mxu1 }
 0x672   :  { %2760 = vtanh.f32 %v822_v38  ;;  %v698_v46 = vadd.f32 %v696_v40, %v3012_v44  ;;  %v2281_v53 = vmul.f32 -1.442695, %v822_v38 }
 0x674   :  { %2762 = vtanh.f32 %v698_v46  ;;  %v2279_v54 = vmul.f32 -1.442695, %v698_v46 }
 0x675   :  { %2764 = vpow2.f32 %v2281_v53 }
 0x676   :  { %2766 = vpow2.f32 %v2279_v54 }
 0x67c   :  { %v2761_v47 = vpop.eup %2760 }
 0x67d   :  { %837 = vrot.lane.b32.xlu0 %v2761_v47, %s2868_s4 }
 0x67e   :  { %v2763_v49 = vpop.eup %2762 }
 0x67f   :  { %713 = vrot.lane.b32.xlu1 %v2763_v49, %s2868_s4  ;;  %v2765_v55 = vpop.eup %2764 }
 0x680   :  { %v826_v56 = vadd.f32 1.0, %v2765_v55  ;;  %v2767_v57 = vpop.eup %2766  ;;  %v981_v55 = vsel %vm980_vm2, 1, %v2867_v50 }
 0x681   :  { %490 = vrot.lane.b32.xlu0 %v3090_v61, %s2870_s1  ;;  %v702_v58 = vadd.f32 1.0, %v2767_v57 }
 0x682   :  { %2768 = vrcp.f32 %v826_v56 }
 0x683   :  { %2770 = vrcp.f32 %v702_v58 }
 0x685   :  { %832 = vrot.lane.b32.xlu0 %v831_v52, %s2869_s15 }
 0x68c   :  { %v2769_v59 = vpop.eup %2768 }
 0x68d   :  { %v2771_v61 = vpop.eup %2770 }
 0x6ef   :  { %v838_v60 = vpop.permute.xlu0 %837 }
 0x6f0   :  { %v840_v63 = vmul.f32 %v2769_v59, %v838_v60 }
 0x6f1   :  { %v714_v0 = vpop.permute.xlu1 %713 }
 0x6f2   :  { %842 = vrot.lane.b32.xlu1 %v840_v63, %s2869_s15  ;;  %v716_v2 = vmul.f32 %v2771_v61, %v714_v0 }
 0x6f3   :  { %v491_v1 = vpop.permute.xlu0 %490 }
 0x6f4   :  { %v493_v5 = vsel %vm478_vm10, %v488_v42, %v491_v1 }
 0x6f5   :  { %v707_v6 = vrot.slane %v493_v5, 4 }
 0x6f6   :  { %718 = vrot.lane.b32.xlu1 %v716_v2, %s2869_s15 }
 0x6f7   :  { %708 = vrot.lane.b32.xlu0 %v707_v6, %s2869_s15  ;;  %v833_v7 = vpop.permute.xlu0 %832 }
 0x6f8   :  { %v835_v8 = vmul.f32 %v2769_v59, %v833_v7 }
 0x764   :  { %v843_v9 = vpop.permute.xlu1 %842 }
 0x765   :  { %v845_v10 = vadd.f32 %v843_v9, %v835_v8 }
 0x767   :  { %2772 = vtanh.f32 %v845_v10  ;;  %v865_v33 = vrot.slane %v845_v10, 2 }
 0x768   :  { %v719_v13 = vpop.permute.xlu1 %718 }
 0x769   :  { %v709_v11 = vpop.permute.xlu0 %708 }
 0x76a   :  { %v711_v12 = vmul.f32 %v2771_v61, %v709_v11 }
 0x76c   :  { %v721_v15 = vadd.f32 %v719_v13, %v711_v12 }
 0x76e   :  { %2774 = vtanh.f32 %v721_v15  ;;  %v741_v37 = vrot.slane %v721_v15, 4 }
 0x771   :  { %v2773_v16 = vpop.eup %2772 }
 0x772   :  { %848 = vrot.lane.b32.xlu0 %v2773_v16, %s2868_s4 }
 0x776   :  { %855 = vperm.xlu0 %2727, %v853_v18  }
 0x778   :  { %v2775_v20 = vpop.eup %2774 }
 0x779   :  { %724 = vrot.lane.b32.xlu1 %v2775_v20, %s2868_s4 }
 0x77d   :  { %731 = vperm.xlu1 %2726, %v729_v21  }
 0x7e4   :  { %v849_v22 = vpop.permute.xlu0 %848 }
 0x7e5   :  { %v851_v30 = vmul.f32 %v2769_v59, %v849_v22 }
 0x7e7   :  { %v859_v32 = vrot.slane %v851_v30, 2 }
 0x7e9   :  { %860 = vrot.lane.b32.xlu0 %v859_v32, %s2869_s15 }
 0x7eb   :  { %v725_v34 = vpop.permute.xlu1 %724 }
 0x7ec   :  { %v727_v29 = vmul.f32 %v2771_v61, %v725_v34 }
 0x7ed   :  { %866 = vrot.lane.b32.xlu0 %v865_v33, %s2870_s1 }
 0x7ee   :  { %v735_v35 = vrot.slane %v727_v29, 4 }
 0x7f0   :  { %736 = vrot.lane.b32.xlu1 %v735_v35, %s2869_s15 }
 0x7f1   :  { %742 = vrot.lane.b32.xlu0 %v741_v37, %s2870_s1 }
 0x7f5   :  { %v3169_v38 = vpop.permute.xlu0 %855 }
 0x7f6   :  { %vm857_vm13 = vcmp.eq.s32.totalorder %v3169_v38, 1 }
 0x7fc   :  { %v3179_v46 = vpop.permute.xlu1 %731 }
 0x7fd   :  { %vm733_vm14 = vcmp.eq.s32.totalorder %v3179_v46, 1 }
 0x85b   :  { %v861_v39 = vpop.permute.xlu0 %860 }
 0x85c   :  { %v863_v40 = vsel %vm857_vm13, %v861_v39, %v3111_v31  ;;  %v872_v43 = vsel %vm857_vm13, %v861_v39, 0.0 }
 0x85d   :  { %873 = vst.msk [vmem:[#allocation3 + $0xa] sm:$0x3] %vm367_vm5, %v872_v43  ;;  %2485 = vmatmul.mubr.msk.f32.vlgmr.msra.gmra.mrb[10].mxu0 %vm48_vm1, %v863_v40 }
 0x85e   :  { %2661 = vmatpush3.bf16.msra.mxu0 %v2966_v23  ;;  %2506 = vmatprep.mubr.msk.f32.mxu0 %vm2866_vm0, %v2865_v4 }
 0x85f   :  { %v867_v47 = vpop.permute.xlu0 %866  ;;  %2662 = vmatprep.subr.bf16.mxu0 %v2864_v3 }
 0x860   :  { %v869_v31 = vsel %vm857_vm13, %v867_v47, %v3147_v51 }
 0x861   :  { %1080 = vrot.lane.b32.xlu0 %v869_v31, %s2869_s15 }
 0x862   :  { %v737_v48 = vpop.permute.xlu1 %736  ;;  %2664 = vmatpush3.bf16.msra.mxu0 %v2983_v27 }
 0x863   :  { %v3194_v49 = vsel %vm733_vm14, %v737_v48, %v3125_v28  ;;  %v870_v52 = vsel %vm733_vm14, %v737_v48, 0.0  ;;  %v743_v53 = vpop.permute.xlu0 %742  ;;  %2671 = vmatprep.subr.bf16.mxu0 %v2864_v3  ;;  %v1101_v28 = vsel %vm1100_vm15, 1, %v2867_v50 }
 0x864   :  { %871 = vst.msk [vmem:[#allocation2 + $0x4] sm:$0x3] %vm367_vm5, %v870_v52  ;;  %v3202_v51 = vsel %vm733_vm14, %v743_v53, %v493_v5  ;;  %2474 = vmatmul.mubr.msk.f32.vlgmr.msra.gmra.mrb[6].mxu1 %vm48_vm1, %v3194_v49 }
 0x865   :  { %v959_v54 = vrot.slane %v3202_v51, 2  ;;  %2655 = vmatpush3.bf16.msra.mxu1 %v2942_v14  ;;  %2495 = vmatprep.mubr.msk.f32.mxu1 %vm2866_vm0, %v2865_v4 }
 0x866   :  { %2656 = vmatprep.subr.bf16.mxu1 %v2864_v3 }
 0x867   :  { %960 = vrot.lane.b32.xlu0 %v959_v54, %s2869_s15 }
 0x869   :  { %2658 = vmatpush3.bf16.msra.mxu1 %v2954_v19 }
 0x86a   :  { %2665 = vmatprep.subr.bf16.mxu1 %v2864_v3 }
 0x86b   :  { %1103 = vperm.xlu0 %2727, %v1101_v28  }
 0x86f   :  { %1106 = vrot.lane.b32.xlu0 %v863_v40, %s2870_s1 }
 0x873   :  { %983 = vperm.xlu0 %2727, %v981_v55  }
 0x8d3   :  { %v3225_v11 = vpop.permute.xlu0 %1080 }
 0x8d9   :  { %v961_v16 = vpop.permute.xlu0 %960 }
 0x8ea   :  { %v3233_v32 = vpop.permute.xlu0 %1103 }
 0x8eb   :  { %vm1105_vm3 = vcmp.eq.s32.totalorder %v3233_v32, 1  ;;  %v2068_v32 = vld [vmem:[%s3488_s5 + $0x38] sm:$0xff] }
 0x8ee   :  { %v1107_v29 = vpop.permute.xlu0 %1106 }
 0x8f2   :  { %v3252_v31 = vpop.permute.xlu0 %983 }
 0x8f3   :  { %vm985_vm7 = vcmp.eq.s32.totalorder %v3252_v31, 1 }
 0x930   :  { %v1067_v56 = vpop.f32.mrb[10].mxu0 }
 0x931   :  { %v1071_v57 = vadd.f32 %v1067_v56, %v3014_v45  ;;  %v2486_v58 = vpop.f32.mrb[11].mxu0 }
 0x933   :  { %2776 = vtanh.f32 %v1071_v57  ;;  %v2285_v61 = vmul.f32 -1.442695, %v1071_v57 }
 0x937   :  { %v943_v42 = vpop.f32.mrb[6].mxu1 }
 0x938   :  { %v948_v59 = vrot.slane %v943_v42, 2  ;;  %v2475_v60 = vpop.f32.mrb[7].mxu1 }
 0x93a   :  { %v950_v63 = vadd.f32 %v948_v59, %v3012_v44 }
 0x93c   :  { %2778 = vtanh.f32 %v950_v63  ;;  %v2283_v50 = vmul.f32 -1.442695, %v950_v63 }
 0x93d   :  { %v2777_v0 = vpop.eup %2776  ;;  %2780 = vpow2.f32 %v2285_v61 }
 0x93e   :  { %1085 = vrot.lane.b32.xlu1 %v2777_v0, %s2868_s4  ;;  %2782 = vpow2.f32 %v2283_v50 }
 0x946   :  { %v2779_v62 = vpop.eup %2778 }
 0x947   :  { %965 = vrot.lane.b32.xlu1 %v2779_v62, %s2868_s4  ;;  %v2781_v1 = vpop.eup %2780 }
 0x948   :  { %v1075_v45 = vadd.f32 1.0, %v2781_v1  ;;  %v2783_v2 = vpop.eup %2782 }
 0x949   :  { %v954_v5 = vadd.f32 1.0, %v2783_v2 }
 0x94a   :  { %2784 = vrcp.f32 %v1075_v45 }
 0x94b   :  { %2786 = vrcp.f32 %v954_v5 }
 0x954   :  { %v2785_v6 = vpop.eup %2784 }
 0x955   :  { %v2787_v8 = vpop.eup %2786  ;;  %v1083_v12 = vmul.f32 %v2785_v6, %v3225_v11 }
 0x956   :  { %v963_v18 = vmul.f32 %v2787_v8, %v961_v16 }
 0x9b0   :  { %v1086_v7 = vpop.permute.xlu1 %1085 }
 0x9b1   :  { %v1088_v44 = vmul.f32 %v2785_v6, %v1086_v7 }
 0x9b3   :  { %1090 = vrot.lane.b32.xlu1 %v1088_v44, %s2869_s15 }
 0x9b9   :  { %v966_v9 = vpop.permute.xlu1 %965 }
 0x9ba   :  { %v968_v10 = vmul.f32 %v2787_v8, %v966_v9 }
 0x9bc   :  { %970 = vrot.lane.b32.xlu1 %v968_v10, %s2869_s15 }
 0xa25   :  { %v1091_v13 = vpop.permute.xlu1 %1090 }
 0xa26   :  { %v3228_v15 = vadd.f32 %v1091_v13, %v1083_v12 }
 0xa28   :  { %2788 = vtanh.f32 %v3228_v15 }
 0xa2e   :  { %v971_v20 = vpop.permute.xlu1 %970 }
 0xa2f   :  { %v973_v21 = vadd.f32 %v971_v20, %v963_v18 }
 0xa31   :  { %2790 = vtanh.f32 %v973_v21  ;;  %v993_v43 = vrot.slane %v973_v21, 6 }
 0xa32   :  { %v2789_v22 = vpop.eup %2788 }
 0xa33   :  { %1096 = vrot.lane.b32.xlu1 %v2789_v22, %s2868_s4 }
 0xa3b   :  { %v2791_v30 = vpop.eup %2790 }
 0xa3c   :  { %976 = vrot.lane.b32.xlu1 %v2791_v30, %s2868_s4 }
 0xaa5   :  { %v1097_v33 = vpop.permute.xlu1 %1096 }
 0xaa6   :  { %v3235_v34 = vmul.f32 %v2785_v6, %v1097_v33 }
 0xaa8   :  { %v1109_v35 = vsel %vm1105_vm3, %v3235_v34, %v1107_v29 }
 0xaa9   :  { %1227 = vrot.lane.b32.xlu1 %v1109_v35, %s2869_s15 }
 0xaae   :  { %v977_v37 = vpop.permute.xlu1 %976 }
 0xaaf   :  { %v979_v39 = vmul.f32 %v2787_v8, %v977_v37  ;;  %v1110_v8 = vsel %vm1105_vm3, %v3228_v15, %v3225_v11 }
 0xab0   :  { %v1313_v9 = vrot.slane %v1110_v8, 2 }
 0xab1   :  { %v987_v40 = vrot.slane %v979_v39, 6 }
 0xab3   :  { %988 = vrot.lane.b32.xlu0 %v987_v40, %s2869_s15 }
 0xab7   :  { %994 = vrot.lane.b32.xlu0 %v993_v43, %s2870_s1 }
 0xb1b   :  { %v3244_v47 = vpop.permute.xlu1 %1227 }
 0xb1c   :  { %2507 = vmatmul.mubr.msk.f32.vlgmr.msra.gmra.mrb[12].mxu0 %vm48_vm1, %v3244_v47 }
 0xb1d   :  { %2673 = vmatpush3.bf16.msra.mxu0 %v2966_v23  ;;  %2528 = vmatprep.mubr.msk.f32.mxu0 %vm2866_vm0, %v2865_v4 }
 0xb1e   :  { %2674 = vmatprep.subr.bf16.mxu0 %v2864_v3 }
 0xb21   :  { %2676 = vmatpush3.bf16.msra.mxu0 %v2983_v27 }
 0xb22   :  { %2683 = vmatprep.subr.bf16.mxu0 %v2864_v3 }
 0xb25   :  { %v989_v48 = vpop.permute.xlu0 %988 }
 0xb26   :  { %v991_v52 = vsel %vm985_vm7, %v989_v48, %v3194_v49  ;;  %v1111_v53 = vsel %vm985_vm7, %v989_v48, 0.0 }
 0xb27   :  { %1112 = vst.msk [vmem:[#allocation2 + $0x6] sm:$0x3] %vm367_vm5, %v1111_v53  ;;  %2496 = vmatmul.mubr.msk.f32.vlgmr.msra.gmra.mrb[8].mxu1 %vm48_vm1, %v991_v52 }
 0xb28   :  { %2667 = vmatpush3.bf16.msra.mxu1 %v2942_v14  ;;  %2517 = vmatprep.mubr.msk.f32.mxu1 %vm2866_vm0, %v2865_v4 }
 0xb29   :  { %2668 = vmatprep.subr.bf16.mxu1 %v2864_v3  ;;  %v995_v60 = vpop.permute.xlu0 %994 }
 0xb2a   :  { %v997_v63 = vsel %vm985_vm7, %v995_v60, %v3202_v51 }
 0xb2c   :  { %2670 = vmatpush3.bf16.msra.mxu1 %v2954_v19 }
 0xb2d   :  { %2677 = vmatprep.subr.bf16.mxu1 %v2864_v3 }
 0xbef   :  { %v1297_v54 = vpop.f32.mrb[12].mxu0 }
 0xbf0   :  { %v1302_v49 = vrot.slane %v1297_v54, 2  ;;  %v2508_v28 = vpop.f32.mrb[13].mxu0 }
 0xbf2   :  { %v1304_v55 = vadd.f32 %v1302_v49, %v3008_v36 }
 0xbf4   :  { %2792 = vtanh.f32 %v1304_v55  ;;  %v2289_v0 = vmul.f32 -1.442695, %v1304_v55 }
 0xbfa   :  { %v1188_v56 = vpop.f32.mrb[8].mxu1 }
 0xbfb   :  { %v1192_v57 = vadd.f32 %v1188_v56, %v3010_v41  ;;  %v2497_v58 = vpop.f32.mrb[9].mxu1 }
 0xbfd   :  { %2794 = vtanh.f32 %v1192_v57  ;;  %v2287_v62 = vmul.f32 -1.442695, %v1192_v57 }
 0xbfe   :  { %v2793_v42 = vpop.eup %2792  ;;  %2796 = vpow2.f32 %v2289_v0 }
 0xbff   :  { %1317 = vrot.lane.b32.xlu1 %v2793_v42, %s2868_s4  ;;  %2798 = vpow2.f32 %v2287_v62 }
 0xc07   :  { %v2795_v59 = vpop.eup %2794 }
 0xc08   :  { %1206 = vrot.lane.b32.xlu1 %v2795_v59, %s2868_s4  ;;  %v2797_v61 = vpop.eup %2796 }
 0xc09   :  { %v1308_v50 = vadd.f32 1.0, %v2797_v61  ;;  %v2799_v1 = vpop.eup %2798 }
 0xc0a   :  { %v1196_v45 = vadd.f32 1.0, %v2799_v1 }
 0xc0b   :  { %2800 = vrcp.f32 %v1308_v50 }
 0xc0c   :  { %1201 = vrot.lane.b32.xlu1 %v997_v63, %s2869_s15  ;;  %2802 = vrcp.f32 %v1196_v45 }
 0xc15   :  { %v2801_v2 = vpop.eup %2800 }
 0xc16   :  { %v2803_v7 = vpop.eup %2802  ;;  %v1315_v10 = vmul.f32 %v2801_v2, %v1313_v9 }
 0xc71   :  { %v1318_v5 = vpop.permute.xlu1 %1317 }
 0xc72   :  { %v1320_v6 = vmul.f32 %v2801_v2, %v1318_v5 }
 0xc74   :  { %1322 = vrot.lane.b32.xlu0 %v1320_v6, %s2869_s15 }
 0xc7a   :  { %v1207_v44 = vpop.permute.xlu1 %1206 }
 0xc7b   :  { %v1209_v51 = vmul.f32 %v2803_v7, %v1207_v44 }
 0xc7d   :  { %1211 = vrot.lane.b32.xlu0 %v1209_v51, %s2869_s15 }
 0xc7e   :  { %v3284_v16 = vpop.permute.xlu1 %1201 }
 0xc7f   :  { %v1204_v18 = vmul.f32 %v2803_v7, %v3284_v16 }
 0xce6   :  { %v1323_v12 = vpop.permute.xlu0 %1322 }
 0xce7   :  { %v1325_v13 = vadd.f32 %v1323_v12, %v1315_v10 }
 0xce9   :  { %2804 = vtanh.f32 %v1325_v13  ;;  %v1340_v29 = vrot.slane %v1325_v13, 6 }
 0xcef   :  { %v1212_v20 = vpop.permute.xlu0 %1211 }
 0xcf0   :  { %v3287_v21 = vadd.f32 %v1212_v20, %v1204_v18 }
 0xcf2   :  { %2806 = vtanh.f32 %v3287_v21  ;;  %v1225_v13 = vsel %vm1105_vm3, %v3287_v21, %v3284_v16 }
 0xcf3   :  { %v2805_v22 = vpop.eup %2804  ;;  %v1443_v20 = vrot.slane %v1225_v13, 6 }
 0xcf4   :  { %1328 = vrot.lane.b32.xlu1 %v2805_v22, %s2868_s4 }
 0xcf8   :  { %1221 = vrot.lane.b32.xlu1 %v991_v52, %s2870_s1 }
 0xcfc   :  { %v2807_v11 = vpop.eup %2806 }
 0xcfd   :  { %1217 = vrot.lane.b32.xlu0 %v2807_v11, %s2868_s4 }
 0xd66   :  { %v1329_v15 = vpop.permute.xlu1 %1328 }
 0xd67   :  { %v1331_v30 = vmul.f32 %v2801_v2, %v1329_v15 }
 0xd69   :  { %v1333_v33 = vrot.slane %v1331_v30, 6 }
 0xd6a   :  { %v1222_v39 = vpop.permute.xlu1 %1221 }
 0xd6b   :  { %1334 = vrot.lane.b32.xlu0 %v1333_v33, %s2869_s15 }
 0xd6f   :  { %1341 = vrot.lane.b32.xlu0 %v1340_v29, %s2870_s1  ;;  %v1218_v35 = vpop.permute.xlu0 %1217 }
 0xd70   :  { %v3295_v37 = vmul.f32 %v2803_v7, %v1218_v35 }
 0xd72   :  { %v1224_v40 = vsel %vm1105_vm3, %v3295_v37, %v1222_v39 }
 0xd73   :  { %1357 = vrot.lane.b32.xlu1 %v1224_v40, %s2869_s15 }
 0xd77   :  { %1344 = vrot.lane.b32.xlu1 %v1110_v8, %s2870_s1 }
 0xddd   :  { %v1335_v43 = vpop.permute.xlu0 %1334 }
 0xdde   :  { %v3305_v48 = vsel %vm985_vm7, %v1335_v43, %v3244_v47  ;;  %v1354_v52 = vsel %vm985_vm7, %v1335_v43, 0.0 }
 0xddf   :  { %1355 = vst.msk [vmem:[#allocation3 + $0x6] sm:$0x3] %vm367_vm5, %v1354_v52  ;;  %2529 = vmatmul.mubr.msk.f32.vlgmr.msra.gmra.mrb[14].mxu0 %vm48_vm1, %v3305_v48 }
 0xde0   :  { %2685 = vmatpush3.bf16.msra.mxu0 %v2966_v23  ;;  %2550 = vmatprep.mubr.msk.f32.mxu0 %vm2866_vm0, %v2865_v4 }
 0xde1   :  { %2686 = vmatprep.subr.bf16.mxu0 %v2864_v3  ;;  %v1342_v59 = vpop.permute.xlu0 %1341 }
 0xde4   :  { %2688 = vmatpush3.bf16.msra.mxu0 %v2983_v27 }
 0xde5   :  { %v3317_v53 = vpop.permute.xlu1 %1357  ;;  %2695 = vmatprep.subr.bf16.mxu0 %v2864_v3 }
 0xde6   :  { %2518 = vmatmul.mubr.msk.f32.vlgmr.msra.gmra.mrb[10].mxu1 %vm48_vm1, %v3317_v53 }
 0xde7   :  { %2679 = vmatpush3.bf16.msra.mxu1 %v2942_v14  ;;  %2539 = vmatprep.mubr.msk.f32.mxu1 %vm2866_vm0, %v2865_v4 }
 0xde8   :  { %2680 = vmatprep.subr.bf16.mxu1 %v2864_v3 }
 0xde9   :  { %v1345_v42 = vpop.permute.xlu1 %1344 }
 0xdea   :  { %v3332_v63 = vsel %vm985_vm7, %v1342_v59, %v1345_v42 }
 0xdeb   :  { %2682 = vmatpush3.bf16.msra.mxu1 %v2954_v19  ;;  %v1563_v0 = vrot.slane %v3332_v63, 4 }
 0xdec   :  { %2689 = vmatprep.subr.bf16.mxu1 %v2864_v3 }
 0xeb2   :  { %v1547_v47 = vpop.f32.mrb[14].mxu0 }
 0xeb3   :  { %v1552_v54 = vrot.slane %v1547_v47, 4  ;;  %v2530_v49 = vpop.f32.mrb[15].mxu0 }
 0xeb5   :  { %v1554_v28 = vadd.f32 %v1552_v54, %v3008_v36 }
 0xeb7   :  { %2808 = vtanh.f32 %v1554_v28  ;;  %v2293_v61 = vmul.f32 -1.442695, %v1554_v28 }
 0xeb9   :  { %v1427_v55 = vpop.f32.mrb[10].mxu1 }
 0xeba   :  { %v1432_v56 = vrot.slane %v1427_v55, 6  ;;  %v2519_v57 = vpop.f32.mrb[11].mxu1 }
 0xebc   :  { %v1434_v58 = vadd.f32 %v1432_v56, %v3010_v41 }
 0xebe   :  { %2810 = vtanh.f32 %v1434_v58  ;;  %v2291_v50 = vmul.f32 -1.442695, %v1434_v58 }
 0xebf   :  { %2812 = vpow2.f32 %v2293_v61 }
 0xec0   :  { %2814 = vpow2.f32 %v2291_v50 }
 0xec1   :  { %v2809_v60 = vpop.eup %2808 }
 0xec2   :  { %1569 = vrot.lane.b32.xlu0 %v2809_v60, %s2868_s4 }
 0xec6   :  { %1564 = vrot.lane.b32.xlu0 %v1563_v0, %s2869_s15 }
 0xec8   :  { %v2811_v62 = vpop.eup %2810 }
 0xec9   :  { %1447 = vrot.lane.b32.xlu1 %v2811_v62, %s2868_s4  ;;  %v2813_v1 = vpop.eup %2812 }
 0xeca   :  { %v1558_v45 = vadd.f32 1.0, %v2813_v1  ;;  %v2815_v2 = vpop.eup %2814 }
 0xecb   :  { %v1438_v31 = vadd.f32 1.0, %v2815_v2 }
 0xecc   :  { %2816 = vrcp.f32 %v1558_v45 }
 0xecd   :  { %2818 = vrcp.f32 %v1438_v31 }
 0xed6   :  { %v2817_v5 = vpop.eup %2816 }
 0xed7   :  { %v2819_v44 = vpop.eup %2818 }
 0xed8   :  { %v1445_v22 = vmul.f32 %v2819_v44, %v1443_v20 }
 0xf34   :  { %v1570_v6 = vpop.permute.xlu0 %1569 }
 0xf35   :  { %v1572_v7 = vmul.f32 %v2817_v5, %v1570_v6 }
 0xf37   :  { %1574 = vrot.lane.b32.xlu1 %v1572_v7, %s2869_s15 }
 0xf38   :  { %v1565_v9 = vpop.permute.xlu0 %1564 }
 0xf39   :  { %v1567_v10 = vmul.f32 %v2817_v5, %v1565_v9 }
 0xf3b   :  { %v1448_v51 = vpop.permute.xlu1 %1447 }
 0xf3c   :  { %v1450_v8 = vmul.f32 %v2819_v44, %v1448_v51 }
 0xf3e   :  { %1452 = vrot.lane.b32.xlu0 %v1450_v8, %s2869_s15 }
 0xfa9   :  { %v1575_v12 = vpop.permute.xlu1 %1574 }
 0xfaa   :  { %v1577_v18 = vadd.f32 %v1575_v12, %v1567_v10 }
 0xfac   :  { %2820 = vtanh.f32 %v1577_v18  ;;  %v1591_v40 = vrot.slane %v1577_v18, 4 }
 0xfb0   :  { %v1453_v11 = vpop.permute.xlu0 %1452 }
 0xfb1   :  { %v1455_v15 = vadd.f32 %v1453_v11, %v1445_v22 }
 0xfb3   :  { %2822 = vtanh.f32 %v1455_v15  ;;  %v1470_v52 = vrot.slane %v1455_v15, 2 }
 0xfb6   :  { %v2821_v30 = vpop.eup %2820 }
 0xfb7   :  { %1580 = vrot.lane.b32.xlu1 %v2821_v30, %s2868_s4 }
 0xfbd   :  { %v2823_v33 = vpop.eup %2822 }
 0xfbe   :  { %1458 = vrot.lane.b32.xlu0 %v2823_v33, %s2868_s4 }
0x1029   :  { %v1581_v29 = vpop.permute.xlu1 %1580 }
0x102a   :  { %v1583_v35 = vmul.f32 %v2817_v5, %v1581_v29 }
0x102c   :  { %v1585_v39 = vrot.slane %v1583_v35, 4 }
0x102e   :  { %1586 = vrot.lane.b32.xlu1 %v1585_v39, %s2869_s15 }
0x1030   :  { %v1459_v16 = vpop.permute.xlu0 %1458 }
0x1031   :  { %v1461_v21 = vmul.f32 %v2819_v44, %v1459_v16 }
0x1032   :  { %1592 = vrot.lane.b32.xlu1 %v1591_v40, %s2870_s1 }
0x1033   :  { %v1463_v43 = vrot.slane %v1461_v21, 2 }
0x1035   :  { %1464 = vrot.lane.b32.xlu0 %v1463_v43, %s2869_s15 }
0x1036   :  { %1471 = vrot.lane.b32.xlu1 %v1470_v52, %s2870_s1 }
0x10a0   :  { %v1587_v47 = vpop.permute.xlu1 %1586 }
0x10a1   :  { %v3353_v54 = vsel %vm733_vm14, %v1587_v47, %v3305_v48  ;;  %v1598_v49 = vsel %vm733_vm14, %v1587_v47, 0.0 }
0x10a2   :  { %1599 = vst.msk [vmem:[#allocation3 + $0x4] sm:$0x3] %vm367_vm5, %v1598_v49  ;;  %2551 = vmatmul.mubr.msk.f32.vlgmr.msra.gmra.mrb[16].mxu0 %vm48_vm1, %v3353_v54 }
0x10a3   :  { %2697 = vmatpush3.bf16.msra.mxu0 %v2966_v23  ;;  %2572 = vmatprep.mubr.msk.f32.mxu0 %vm2866_vm0, %v2865_v4 }
0x10a4   :  { %2698 = vmatprep.subr.bf16.mxu0 %v2864_v3  ;;  %v1593_v60 = vpop.permute.xlu1 %1592 }
0x10a7   :  { %v1465_v28 = vpop.permute.xlu0 %1464  ;;  %2700 = vmatpush3.bf16.msra.mxu0 %v2983_v27 }
0x10a8   :  { %v3368_v48 = vsel %vm857_vm13, %v1465_v28, %v3317_v53  ;;  %v1596_v55 = vsel %vm857_vm13, %v1465_v28, 0.0  ;;  %v1472_v31 = vpop.permute.xlu1 %1471 }
0x10a9   :  { %1597 = vst.msk [vmem:[#allocation2 + $0xa] sm:$0x3] %vm367_vm5, %v1596_v55  ;;  %2540 = vmatmul.mubr.msk.f32.vlgmr.msra.gmra.mrb[12].mxu1 %vm48_vm1, %v3368_v48 }
0x10aa   :  { %2691 = vmatpush3.bf16.msra.mxu1 %v2942_v14  ;;  %2561 = vmatprep.mubr.msk.f32.mxu1 %vm2866_vm0, %v2865_v4 }
0x10ab   :  { %2692 = vmatprep.subr.bf16.mxu1 %v2864_v3  ;;  %v1595_v3 = vsel %vm733_vm14, %v1593_v60, %v3332_v63 }
0x10ae   :  { %2694 = vmatpush3.bf16.msra.mxu1 %v2954_v19  ;;  %v1803_v19 = vrot.slane %v1595_v3, 6 }
0x1175   :  { %v1787_v23 = vpop.f32.mrb[16].mxu0 }
0x1176   :  { %v1792_v27 = vrot.slane %v1787_v23, 6  ;;  %v2552_v53 = vpop.f32.mrb[17].mxu0 }
0x1178   :  { %v1794_v56 = vadd.f32 %v1792_v27, %v3008_v36 }
0x117a   :  { %2824 = vtanh.f32 %v1794_v56  ;;  %v2297_v0 = vmul.f32 -1.442695, %v1794_v56 }
0x117c   :  { %v1669_v57 = vpop.f32.mrb[12].mxu1 }
0x117d   :  { %v1674_v58 = vrot.slane %v1669_v57, 4  ;;  %v2541_v42 = vpop.f32.mrb[13].mxu1 }
0x117f   :  { %v1676_v59 = vadd.f32 %v1674_v58, %v3010_v41 }
0x1181   :  { %2826 = vtanh.f32 %v1676_v59  ;;  %v2295_v62 = vmul.f32 -1.442695, %v1676_v59 }
0x1182   :  { %2828 = vpow2.f32 %v2297_v0 }
0x1183   :  { %2830 = vpow2.f32 %v2295_v62 }
0x1184   :  { %v2825_v14 = vpop.eup %2824 }
0x1185   :  { %1809 = vrot.lane.b32.xlu0 %v2825_v14, %s2868_s4 }
0x1189   :  { %1474 = vrot.lane.b32.xlu0 %v1225_v13, %s2870_s1 }
0x118b   :  { %v2827_v4 = vpop.eup %2826 }
0x118c   :  { %1691 = vrot.lane.b32.xlu1 %v2827_v4, %s2868_s4  ;;  %v2829_v61 = vpop.eup %2828 }
0x118d   :  { %1804 = vrot.lane.b32.xlu0 %v1803_v19, %s2869_s15  ;;  %v1798_v50 = vadd.f32 1.0, %v2829_v61  ;;  %v2831_v1 = vpop.eup %2830 }
0x118e   :  { %v1680_v45 = vadd.f32 1.0, %v2831_v1 }
0x118f   :  { %2832 = vrcp.f32 %v1798_v50 }
0x1190   :  { %2834 = vrcp.f32 %v1680_v45 }
0x1199   :  { %v2833_v46 = vpop.eup %2832 }
0x119a   :  { %v2835_v44 = vpop.eup %2834 }
0x11f7   :  { %v1810_v63 = vpop.permute.xlu0 %1809 }
0x11f8   :  { %v1812_v2 = vmul.f32 %v2833_v46, %v1810_v63 }
0x11fa   :  { %1814 = vrot.lane.b32.xlu1 %v1812_v2, %s2869_s15 }
0x11fb   :  { %v1475_v5 = vpop.permute.xlu0 %1474 }
0x11fc   :  { %v1477_v6 = vsel %vm857_vm13, %v1472_v31, %v1475_v5 }
0x11fd   :  { %v1685_v7 = vrot.slane %v1477_v6, 4 }
0x11fe   :  { %v1692_v51 = vpop.permute.xlu1 %1691 }
0x11ff   :  { %v1694_v8 = vmul.f32 %v2835_v44, %v1692_v51  ;;  %1686 = vrot.lane.b32.xlu0 %v1685_v7, %s2869_s15  ;;  %v1805_v9 = vpop.permute.xlu0 %1804 }
0x1200   :  { %v1807_v10 = vmul.f32 %v2833_v46, %v1805_v9 }
0x1201   :  { %1696 = vrot.lane.b32.xlu1 %v1694_v8, %s2869_s15 }
0x126c   :  { %v1815_v12 = vpop.permute.xlu1 %1814 }
0x126d   :  { %v1817_v13 = vadd.f32 %v1815_v12, %v1807_v10  ;;  %v1113_v10 = vsel %vm1105_vm3, %v3235_v34, 0.0  ;;  %v1348_v12 = vsel %vm1105_vm3, %v3295_v37, 0.0  ;;  %v2067_v34 = vld [vmem:[%s3488_s5 + $0x30] sm:$0xff] }
0x126e   :  { %v2705_v37 = vpack.c.bf16 %v2068_v32, %v2067_v34 }
0x126f   :  { %2836 = vtanh.f32 %v1817_v13  ;;  %v1831_v35 = vrot.slane %v1817_v13, 2  ;;  %v2065_v13 = vld [vmem:[%s3488_s5 + $0x20] sm:$0xff] }
0x1271   :  { %v1687_v18 = vpop.permute.xlu0 %1686 }
0x1272   :  { %v1689_v20 = vmul.f32 %v2835_v44, %v1687_v18  ;;  %v2066_v18 = vld [vmem:[%s3488_s5 + $0x28] sm:$0xff] }
0x1273   :  { %v1697_v22 = vpop.permute.xlu1 %1696 }
0x1274   :  { %v1699_v11 = vadd.f32 %v1697_v22, %v1689_v20  ;;  %v2701_v20 = vpack.c.bf16 %v2066_v18, %v2065_v13 }
0x1276   :  { %2838 = vtanh.f32 %v1699_v11  ;;  %v1713_v21 = vrot.slane %v1699_v11, 4  ;;  %2702 = vmatprep.subr.bf16.mxu1 %v2701_v20  ;;  %v2061_v11 = vld [vmem:[%s3488_s5] sm:$0xff] }
0x1279   :  { %v2837_v38 = vpop.eup %2836 }
0x127a   :  { %1820 = vrot.lane.b32.xlu0 %v2837_v38, %s2868_s4  ;;  %v2062_v38 = vld [vmem:[%s3488_s5 + $0x8] sm:$0xff] }
0x1280   :  { %v2839_v15 = vpop.eup %2838 }
0x1281   :  { %1702 = vrot.lane.b32.xlu1 %v2839_v15, %s2868_s4 }
0x12ec   :  { %v1821_v30 = vpop.permute.xlu0 %1820 }
0x12ed   :  { %v1823_v33 = vmul.f32 %v2833_v46, %v1821_v30  ;;  %v2709_v30 = vpack.c.bf16 %v2062_v38, %v2061_v11 }
0x12ef   :  { %v1825_v29 = vrot.slane %v1823_v33, 2 }
0x12f1   :  { %1826 = vrot.lane.b32.xlu0 %v1825_v29, %s2869_s15 }
0x12f3   :  { %v1703_v39 = vpop.permute.xlu1 %1702 }
0x12f4   :  { %v1705_v40 = vmul.f32 %v2835_v44, %v1703_v39 }
0x12f5   :  { %1832 = vrot.lane.b32.xlu0 %v1831_v35, %s2870_s1 }
0x12f6   :  { %v1707_v16 = vrot.slane %v1705_v40, 4 }
0x12f8   :  { %1708 = vrot.lane.b32.xlu1 %v1707_v16, %s2869_s15 }
0x12f9   :  { %1714 = vrot.lane.b32.xlu0 %v1713_v21, %s2870_s1 }
0x1363   :  { %v1827_v43 = vpop.permute.xlu0 %1826 }
0x1364   :  { %v1829_v52 = vsel %vm478_vm10, %v1827_v43, %v3353_v54  ;;  %v1838_v47 = vsel %vm478_vm10, %v1827_v43, 0.0  ;;  %v2064_v43 = vld [vmem:[%s3488_s5 + $0x18] sm:$0xff] }
0x1365   :  { %1839 = vst.msk [vmem:[#allocation3 + $0x2] sm:$0x3] %vm367_vm5, %v1838_v47  ;;  %2573 = vmatmul.mubr.msk.f32.vlgmr.msra.gmra.mrb[18].mxu0 %vm48_vm1, %v1829_v52  ;;  %v2713_v47 = vpack.c.bf16 %v2064_v43, %v2063_v17 }
0x1367   :  { %v1833_v49 = vpop.permute.xlu0 %1832 }
0x1368   :  { %v1835_v28 = vsel %vm478_vm10, %v1833_v49, %v1595_v3 }
0x1369   :  { %2028 = vrot.lane.b32.xlu0 %v1835_v28, %s2869_s15 }
0x136a   :  { %v1709_v55 = vpop.permute.xlu1 %1708 }
0x136b   :  { %v1711_v23 = vsel %vm605_vm9, %v1709_v55, %v3368_v48  ;;  %v1836_v54 = vsel %vm605_vm9, %v1709_v55, 0.0  ;;  %v1715_v27 = vpop.permute.xlu0 %1714  ;;  %v2069_v55 = vld [vmem:[#allocation2] sm:$0xff] }
0x136c   :  { %1837 = vst.msk [vmem:[#allocation2 + $0xc] sm:$0x3] %vm367_vm5, %v1836_v54  ;;  %v1717_v53 = vsel %vm605_vm9, %v1715_v27, %v1477_v6  ;;  %2562 = vmatmul.mubr.msk.f32.vlgmr.msra.gmra.mrb[14].mxu1 %vm48_vm1, %v1711_v23  ;;  %v2306_v27 = vld [vmem:[%s3489_s6] ss:$0 sm:$0xff] }
0x136d   :  { %v1925_v26 = vrot.slane %v1717_v53, 2  ;;  %2704 = vmatpush3.bf16.msra.mxu1 %v2701_v20 }
0x136e   :  { %2706 = vmatprep.subr.bf16.mxu1 %v2705_v37 }
0x136f   :  { %1926 = vrot.lane.b32.xlu0 %v1925_v26, %s2869_s15 }
0x1371   :  { %2708 = vmatpush3.bf16.msra.mxu1 %v2705_v37 }
0x1372   :  { %2710 = vmatprep.subr.bf16.mxu1 %v2709_v30 }
0x13db   :  { %v2029_v63 = vpop.permute.xlu0 %2028 }
0x13e1   :  { %v1927_v6 = vpop.permute.xlu0 %1926 }
0x1438   :  { %v2015_v56 = vpop.f32.mrb[18].mxu0 }
0x1439   :  { %v2019_v57 = vadd.f32 %v2015_v56, %v3008_v36  ;;  %v2574_v58 = vpop.f32.mrb[19].mxu0 }
0x143b   :  { %2840 = vtanh.f32 %v2019_v57  ;;  %v2301_v3 = vmul.f32 -1.442695, %v2019_v57 }
0x143f   :  { %v1909_v48 = vpop.f32.mrb[14].mxu1 }
0x1440   :  { %v1914_v42 = vrot.slane %v1909_v48, 2  ;;  %v2563_v59 = vpop.f32.mrb[15].mxu1 }
0x1442   :  { %v1916_v14 = vadd.f32 %v1914_v42, %v3010_v41 }
0x1444   :  { %2842 = vtanh.f32 %v1916_v14  ;;  %v2299_v4 = vmul.f32 -1.442695, %v1916_v14 }
0x1445   :  { %v2841_v60 = vpop.eup %2840  ;;  %2844 = vpow2.f32 %v2301_v3 }
0x1446   :  { %2033 = vrot.lane.b32.xlu1 %v2841_v60, %s2868_s4  ;;  %2846 = vpow2.f32 %v2299_v4 }
0x144e   :  { %v2843_v24 = vpop.eup %2842 }
0x144f   :  { %1931 = vrot.lane.b32.xlu1 %v2843_v24, %s2868_s4  ;;  %v2845_v19 = vpop.eup %2844 }
0x1450   :  { %v2023_v36 = vadd.f32 1.0, %v2845_v19  ;;  %v2847_v0 = vpop.eup %2846 }
0x1451   :  { %v1920_v62 = vadd.f32 1.0, %v2847_v0 }
0x1452   :  { %2848 = vrcp.f32 %v2023_v36 }
0x1453   :  { %2850 = vrcp.f32 %v1920_v62 }
0x145c   :  { %v2849_v61 = vpop.eup %2848 }
0x145d   :  { %v2851_v1 = vpop.eup %2850  ;;  %v2031_v2 = vmul.f32 %v2849_v61, %v2029_v63 }
0x145e   :  { %v1929_v7 = vmul.f32 %v2851_v1, %v1927_v6 }
0x14b8   :  { %v2034_v50 = vpop.permute.xlu1 %2033 }
0x14b9   :  { %v2036_v41 = vmul.f32 %v2849_v61, %v2034_v50 }
0x14bb   :  { %2038 = vrot.lane.b32.xlu1 %v2036_v41, %s2869_s15 }
0x14c1   :  { %v1932_v45 = vpop.permute.xlu1 %1931 }
0x14c2   :  { %v1934_v46 = vmul.f32 %v2851_v1, %v1932_v45 }
0x14c4   :  { %1936 = vrot.lane.b32.xlu1 %v1934_v46, %s2869_s15 }
0x152d   :  { %v2039_v31 = vpop.permute.xlu1 %2038 }
0x152e   :  { %v2041_v5 = vadd.f32 %v2039_v31, %v2031_v2 }
0x1530   :  { %2852 = vtanh.f32 %v2041_v5 }
0x1536   :  { %v1937_v44 = vpop.permute.xlu1 %1936 }
0x1537   :  { %v1939_v51 = vadd.f32 %v1937_v44, %v1929_v7 }
0x1539   :  { %2854 = vtanh.f32 %v1939_v51 }
0x153a   :  { %v2853_v8 = vpop.eup %2852 }
0x153b   :  { %2044 = vrot.lane.b32.xlu0 %v2853_v8, %s2868_s4 }
0x1543   :  { %v2855_v9 = vpop.eup %2854 }
0x1544   :  { %1942 = vrot.lane.b32.xlu1 %v2855_v9, %s2868_s4 }
0x1548   :  { %1115 = vrot.lane.b32.xlu1 %v1113_v10, %s2869_s15 }
0x154c   :  { %1350 = vrot.lane.b32.xlu1 %v1348_v12, %s2869_s15 }
0x15ad   :  { %v2045_v22 = vpop.permute.xlu0 %2044 }
0x15ae   :  { %v2047_v15 = vmul.f32 %v2849_v61, %v2045_v22 }
0x15b0   :  { %v2055_v33 = vsel %vm244_vm4, %v2047_v15, 0.0 }
0x15b1   :  { %2057 = vrot.lane.b32.xlu0 %v2055_v33, %s2869_s15 }
0x15b6   :  { %v1943_v29 = vpop.permute.xlu1 %1942 }
0x15b7   :  { %v1945_v35 = vmul.f32 %v2851_v1, %v1943_v29 }
0x15b9   :  { %v2049_v39 = vrot.slane %v1945_v35, 6 }
0x15ba   :  { %v1116_v40 = vpop.permute.xlu1 %1115 }
0x15bb   :  { %1118 = vst.msk [vmem:[#allocation3 + $0x8] sm:$0x3] %vm367_vm5, %v1116_v40  ;;  %2050 = vrot.lane.b32.xlu0 %v2049_v39, %s2869_s15 }
0x15be   :  { %v1351_v16 = vpop.permute.xlu1 %1350 }
0x15bf   :  { %1353 = vst.msk [vmem:[#allocation2 + $0x8] sm:$0x3] %vm367_vm5, %v1351_v16 }
0x15c2   :  { %v2072_v49 = vld [vmem:[#allocation3 + $0x8] sm:$0xff] }
0x1623   :  { %v2058_v21 = vpop.permute.xlu0 %2057 }
0x1624   :  { %2060 = vst.msk [vmem:[#allocation3] sm:$0x3] %vm367_vm5, %v2058_v21 }
0x162b   :  { %v2071_v52 = vld [vmem:[#allocation3] sm:$0xff] }
0x162c   :  { %2583 = vmatprep.mubr.msk.f32.mxu1 %vm48_vm1, %v2071_v52 }
0x162d   :  { %2584 = vmatmul.mubr.msk.f32.vlgmr.msra.gmra.mrb[16].mxu1 %vm48_vm1, %v2072_v49  ;;  %v2051_v28 = vpop.permute.xlu0 %2050 }
0x162e   :  { %v2053_v23 = vsel %vm350_vm6, %v2051_v28, 0.0  ;;  %2594 = vmatprep.mubr.msk.f32.mxu1 %vm48_vm1, %v2069_v55  ;;  %2712 = vmatpush3.bf16.msra.mxu1 %v2709_v30 }
0x162f   :  { %2054 = vst.msk [vmem:[#allocation2 + $0xe] sm:$0x3] %vm367_vm5, %v2053_v23  ;;  %2714 = vmatprep.subr.bf16.mxu1 %v2713_v47 }
0x1632   :  { %2716 = vmatpush3.bf16.msra.mxu1 %v2713_v47 }
0x1636   :  { %v2070_v54 = vld [vmem:[#allocation2 + $0x8] sm:$0xff] }
0x1637   :  { %2595 = vmatmul.mubr.msk.f32.vlgmr.msra.gmra.mrb[16].mxu1 %vm48_vm1, %v2070_v54 }
0x170a   :  { %v2596_v53 = vpop.f32.mrb[16].mxu1 }
0x170b   :  { %v2243_v26 = vadd.f32 %v2596_v53, %v2306_v27  ;;  %v2226_v56 = vpop.f32.mrb[17].mxu1 }
0x170c   :  { %v2242_v57 = vadd.f32 %v2306_v27, %v2226_v56 }
0x170d   :  { %2246 = vmax.xlane.f32.xlu1 %v2243_v26 }
0x170e   :  { %2244 = vmax.xlane.f32.xlu0 %v2242_v57 }
0x179a   :  { %v2247_v25 = vpop.xlane.xlu1 %2246 }
0x179b   :  { %v2245_v58 = vpop.xlane.xlu0 %2244  ;;  %v2249_v48 = vsub.f32 %v2243_v26, %v2247_v25 }
0x179c   :  { %v2248_v42 = vsub.f32 %v2242_v57, %v2245_v58 }
0x179d   :  { %v2252_v14 = vmul.f32 1.442695, %v2249_v48 }
0x179e   :  { %v2250_v59 = vmul.f32 1.442695, %v2248_v42 }
0x17a0   :  { %2856 = vpow2.f32 %v2250_v59 }
0x17a1   :  { %2858 = vpow2.f32 %v2252_v14 }
0x17aa   :  { %v2857_v60 = vpop.eup %2856 }
0x17ab   :  { %2254 = vadd.xlane.f32.xlu0 %v2857_v60  ;;  %v2859_v24 = vpop.eup %2858 }
0x17af   :  { %2256 = vadd.xlane.f32.xlu0 %v2859_v24 }
0x1838   :  { %v2255_v3 = vpop.xlane.xlu0 %2254 }
0x1839   :  { %2860 = vlog2.f32 %v2255_v3 }
0x183c   :  { %v2257_v4 = vpop.xlane.xlu0 %2256 }
0x183d   :  { %2862 = vlog2.f32 %v2257_v4 }
0x1843   :  { %v2861_v19 = vpop.eup %2860 }
0x1844   :  { %v2259_v36 = vmul.f32 0.6931472, %v2861_v19 }
0x1846   :  { %v2262_v0 = vsub.f32 %v2248_v42, %v2259_v36 }
0x1847   :  { %v2863_v62 = vpop.eup %2862 }
0x1848   :  { %2264 = vst [vmem:[%s3490_s7] sm:$0xff] %v2262_v0  ;;  %v2261_v61 = vmul.f32 0.6931472, %v2863_v62 }
0x184a   :  { %v2263_v50 = vsub.f32 %v2249_v48, %v2261_v61 }
0x184c   :  { %2265 = vst [vmem:[%s3490_s7 + $0x8] sm:$0xff] %v2263_v50 }

</bundles_post_ra>
